<compile_context>
chip_gen: v7x
topology: tpu7x:2x2x1
jax: 0.10.0
libtpu: 0.0.40
codegen_flags: <defaults>
</compile_context>

<pallas_src>
import jax
import jax.numpy as jnp
from jax.experimental import pallas as pl
from jax.experimental.pallas import tpu as pltpu

# ---------------- small synthetic config (consistent with the module) ----------------
B, S, H = 2, 8, 32          # batch, max_length (seq), hidden_size
NUM_HEADS = 2
HEAD_DIM = H // NUM_HEADS
INTERMEDIATE = 64
NUM_LAYERS = 2
VOCAB = 100
NUM_CLASSES = 3             # num_classes
M = B * S                   # flattened token count

_VMEM_SPEC = pl.BlockSpec(memory_space=pltpu.MemorySpace.VMEM)


# ---------------- in-kernel helpers ----------------
def _layernorm(x, g, b, eps=1e-12):
    mu = jnp.mean(x, axis=-1, keepdims=True)
    var = jnp.mean((x - mu) ** 2, axis=-1, keepdims=True)
    return (x - mu) * jax.lax.rsqrt(var + eps) * g + b


def _gelu(x):
    # tanh approximation of GELU (HF BERT's default is erf-based; delta is tiny)
    return 0.5 * x * (1.0 + jnp.tanh(0.7978845608028654 * (x + 0.044715 * x * x * x)))


# ---------------- single fused Pallas kernel: embeddings + encoder + head ----------------
def fused_forward_kernel(ids_ref, mask_ref,
                         word_emb_ref, pos_emb_ref, emb_ln_g_ref, emb_ln_b_ref,
                         wqkv_ref, bqkv_ref, wo_ref, bo_ref,
                         ln1g_ref, ln1b_ref, w1_ref, b1_ref,
                         w2_ref, b2_ref, ln2g_ref, ln2b_ref,
                         wfc_ref, bfc_ref,
                         out_ref):
    # ---- embeddings: in-kernel "gather" via one-hot matmul (no native gather) ----
    ids = ids_ref[...]                                           # (M, 1) int32
    vocab_iota = jax.lax.broadcasted_iota(jnp.int32, (M, VOCAB), 1)
    onehot = (ids == vocab_iota).astype(jnp.float32)             # (M, VOCAB)
    pos = jnp.concatenate([pos_emb_ref[...]] * B, axis=0)        # (M, H)
    x = jnp.dot(onehot, word_emb_ref[...],
                preferred_element_type=jnp.float32) + pos        # (M, H)
    x = _layernorm(x, emb_ln_g_ref[...], emb_ln_b_ref[...])

    # additive attention bias from the padding mask: (B, 1, S)
    mask = mask_ref[...]                                         # (B, S) in {0, 1}
    bias = (1.0 - mask)[:, None, :] * -1e9

    scale = 1.0 / (HEAD_DIM ** 0.5)

    for li in range(NUM_LAYERS):                                 # unrolled at trace time
        # fused Q/K/V projection: one (M, H) @ (H, 3H) matmul
        qkv = jnp.dot(x, wqkv_ref[li],
                      preferred_element_type=jnp.float32) + bqkv_ref[li]   # (M, 3H)
        qkv3 = qkv.reshape(B, S, 3 * H)

        wo_l = wo_ref[li]                                        # (NUM_HEADS, HEAD_DIM, H)
        attn = jnp.zeros((M, H), jnp.float32)
        for n in range(NUM_HEADS):                               # NUM_HEADS == 2, static
            lo = n * HEAD_DIM
            q_n = qkv3[:, :, lo:lo + HEAD_DIM] * scale           # scale folded into q
            k_n = qkv3[:, :, H + lo:H + lo + HEAD_DIM]
            v_n = qkv3[:, :, 2 * H + lo:2 * H + lo + HEAD_DIM]
            s = jnp.einsum('bqd,bkd->bqk', q_n, k_n,
                           preferred_element_type=jnp.float32) + bias
            m = jnp.max(s, axis=-1, keepdims=True)
            p = jnp.exp(s - m)
            p = p * pl.reciprocal(jnp.sum(p, axis=-1, keepdims=True), approx=True)
            ctx = jnp.einsum('bqk,bkd->bqd', p, v_n,
                             preferred_element_type=jnp.float32)  # (B, S, HEAD_DIM)
            # sum of per-head output projections == concat(heads) @ wo
            attn = attn + jnp.dot(ctx.reshape(M, HEAD_DIM), wo_l[n],
                                  preferred_element_type=jnp.float32)
        attn = attn + bo_ref[li]
        x = _layernorm(x + attn, ln1g_ref[li], ln1b_ref[li])

        ffn = _gelu(jnp.dot(x, w1_ref[li],
                            preferred_element_type=jnp.float32) + b1_ref[li])
        ffn = jnp.dot(ffn, w2_ref[li],
                      preferred_element_type=jnp.float32) + b2_ref[li]
        x = _layernorm(x + ffn, ln2g_ref[li], ln2b_ref[li])

    # ---- max_pooling header + fc + LogSoftmax ----
    # NOTE: like the PyTorch reference, padded positions are NOT masked before
    # the max over the sequence axis.
    pooled = jnp.max(x.reshape(B, S, H), axis=1)                 # (B, H)
    logits = jnp.dot(pooled, wfc_ref[...],
                     preferred_element_type=jnp.float32) + bfc_ref[...]   # (B, C)
    mx = jnp.max(logits, axis=-1, keepdims=True)
    lse = mx + jnp.log(jnp.sum(jnp.exp(logits - mx), axis=-1, keepdims=True))
    out_ref[...] = logits - lse


# ---------------- deterministic parameter init (stacked per-layer weights) ----------------
def init_params(key):
    def nrm(k, shape, scale=0.02):
        return scale * jax.random.normal(k, shape, dtype=jnp.float32)

    keys = jax.random.split(key, 4 + NUM_LAYERS)
    wqkv, bqkv, wo_h, bo = [], [], [], []
    ln1g, ln1b, w1, b1, w2, b2, ln2g, ln2b = [], [], [], [], [], [], [], []
    for li in range(NUM_LAYERS):
        lk = jax.random.split(keys[4 + li], 8)
        wq, wk, wv = nrm(lk[0], (H, H)), nrm(lk[1], (H, H)), nrm(lk[2], (H, H))
        wqkv.append(jnp.concatenate([wq, wk, wv], axis=1))       # (H, 3H) fused QKV
        bqkv.append(jnp.zeros((1, 3 * H), jnp.float32))
        wo = nrm(lk[3], (H, H))
        wo_h.append(wo.reshape(NUM_HEADS, HEAD_DIM, H))          # per-head output proj
        bo.append(jnp.zeros((1, H), jnp.float32))
        ln1g.append(jnp.ones((1, H), jnp.float32))
        ln1b.append(jnp.zeros((1, H), jnp.float32))
        w1.append(nrm(lk[4], (H, INTERMEDIATE)))
        b1.append(jnp.zeros((1, INTERMEDIATE), jnp.float32))
        w2.append(nrm(lk[5], (INTERMEDIATE, H)))
        b2.append(jnp.zeros((1, H), jnp.float32))
        ln2g.append(jnp.ones((1, H), jnp.float32))
        ln2b.append(jnp.zeros((1, H), jnp.float32))

    return {
        'word_emb': nrm(keys[0], (VOCAB, H)),
        'pos_emb': nrm(keys[1], (S, H)),
        'emb_ln_g': jnp.ones((1, H), jnp.float32),
        'emb_ln_b': jnp.zeros((1, H), jnp.float32),
        'wfc': nrm(keys[2], (H, NUM_CLASSES)),
        'bfc': jnp.zeros((1, NUM_CLASSES), jnp.float32),
        'wqkv': jnp.stack(wqkv), 'bqkv': jnp.stack(bqkv),
        'wo_h': jnp.stack(wo_h), 'bo': jnp.stack(bo),
        'ln1g': jnp.stack(ln1g), 'ln1b': jnp.stack(ln1b),
        'w1': jnp.stack(w1), 'b1': jnp.stack(b1),
        'w2': jnp.stack(w2), 'b2': jnp.stack(b2),
        'ln2g': jnp.stack(ln2g), 'ln2b': jnp.stack(ln2b),
    }


# ---------------- full forward: one pallas_call ----------------
@jax.jit
def hate_speech_forward(params, input_ids, attention_mask):
    ids_col = input_ids.reshape(M, 1).astype(jnp.int32)      # lane-broadcast-friendly
    mask = attention_mask.astype(jnp.float32)
    args = (ids_col, mask,
            params['word_emb'], params['pos_emb'],
            params['emb_ln_g'], params['emb_ln_b'],
            params['wqkv'], params['bqkv'], params['wo_h'], params['bo'],
            params['ln1g'], params['ln1b'], params['w1'], params['b1'],
            params['w2'], params['b2'], params['ln2g'], params['ln2b'],
            params['wfc'], params['bfc'])
    return pl.pallas_call(
        fused_forward_kernel,
        out_shape=jax.ShapeDtypeStruct((B, NUM_CLASSES), jnp.float32),
        in_specs=[_VMEM_SPEC] * len(args),
        out_specs=_VMEM_SPEC,
    )(*args)


if __name__ == "__main__":
    key = jax.random.PRNGKey(0)
    k_ids, k_params = jax.random.split(key)

    input_ids = jax.random.randint(k_ids, (B, S), 0, VOCAB, dtype=jnp.int32)
    attention_mask = jnp.ones((B, S), dtype=jnp.int32)
    attention_mask = attention_mask.at[1, 6:].set(0)   # ragged second example

    params = init_params(k_params)
    out = hate_speech_forward(params, input_ids, attention_mask)
    out = jax.block_until_ready(out)

    assert out.shape == (B, NUM_CLASSES)
    # log_softmax rows should sum to ~1 after exp
    assert jnp.allclose(jnp.sum(jnp.exp(out), axis=1), 1.0, atol=1e-4)
    print("KERNEL_OK")
</pallas_src>

<mosaic_0001>
module attributes {stable_mosaic.version = 11 : i64} {
  func.func @fused_forward_kernel(%arg0: memref<16x1xi32, #tpu.memory_space<vmem>>, %arg1: memref<2x8xf32, #tpu.memory_space<vmem>>, %arg2: memref<100x32xf32, #tpu.memory_space<vmem>>, %arg3: memref<8x32xf32, #tpu.memory_space<vmem>>, %arg4: memref<1x32xf32, #tpu.memory_space<vmem>>, %arg5: memref<1x32xf32, #tpu.memory_space<vmem>>, %arg6: memref<2x32x96xf32, #tpu.memory_space<vmem>>, %arg7: memref<2x1x96xf32, #tpu.memory_space<vmem>>, %arg8: memref<2x2x16x32xf32, #tpu.memory_space<vmem>>, %arg9: memref<2x1x32xf32, #tpu.memory_space<vmem>>, %arg10: memref<2x1x32xf32, #tpu.memory_space<vmem>>, %arg11: memref<2x1x32xf32, #tpu.memory_space<vmem>>, %arg12: memref<2x32x64xf32, #tpu.memory_space<vmem>>, %arg13: memref<2x1x64xf32, #tpu.memory_space<vmem>>, %arg14: memref<2x64x32xf32, #tpu.memory_space<vmem>>, %arg15: memref<2x1x32xf32, #tpu.memory_space<vmem>>, %arg16: memref<2x1x32xf32, #tpu.memory_space<vmem>>, %arg17: memref<2x1x32xf32, #tpu.memory_space<vmem>>, %arg18: memref<32x3xf32, #tpu.memory_space<vmem>>, %arg19: memref<1x3xf32, #tpu.memory_space<vmem>>, %arg20: memref<2x3xf32, #tpu.memory_space<vmem>>) attributes {dimension_semantics = [], scalar_prefetch = 0 : i64, scratch_operands = 0 : i64, tpu.core_type = #tpu.core_type<tc>} {
    %c0 = arith.constant 0 : index
    %c0_0 = arith.constant 0 : index
    %0 = vector.load %arg0[%c0, %c0_0] : memref<16x1xi32, #tpu.memory_space<vmem>>, vector<16x1xi32>
    %1 = tpu.iota {dimensions = array<i32: 1>} : vector<16x100xi32>
    %2 = vector.broadcast %0 : vector<16x1xi32> to vector<16x100xi32>
    %3 = arith.cmpi eq, %2, %1 : vector<16x100xi32>
    %4 = arith.extui %3 : vector<16x100xi1> to vector<16x100xi32>
    %5 = arith.sitofp %4 : vector<16x100xi32> to vector<16x100xf32>
    %c0_1 = arith.constant 0 : index
    %c0_2 = arith.constant 0 : index
    %6 = vector.load %arg3[%c0_1, %c0_2] : memref<8x32xf32, #tpu.memory_space<vmem>>, vector<8x32xf32>
    %7 = tpu.concatenate %6, %6 in 0 : vector<8x32xf32>, vector<8x32xf32> -> vector<16x32xf32>
    %c0_3 = arith.constant 0 : index
    %c0_4 = arith.constant 0 : index
    %8 = vector.load %arg2[%c0_3, %c0_4] : memref<100x32xf32, #tpu.memory_space<vmem>>, vector<100x32xf32>
    %cst = arith.constant dense<0.000000e+00> : vector<16x32xf32>
    %9 = tpu.matmul %5, %8, %cst {dimension_numbers = #tpu.dot_dimension_numbers<[1], [0], [0], [1], [0, 0, 1, 1], [], []>} : vector<16x100xf32>, vector<100x32xf32>, vector<16x32xf32> -> vector<16x32xf32>
    %10 = arith.addf %9, %7 : vector<16x32xf32>
    %c0_5 = arith.constant 0 : index
    %c0_6 = arith.constant 0 : index
    %11 = vector.load %arg4[%c0_5, %c0_6] : memref<1x32xf32, #tpu.memory_space<vmem>>, vector<1x32xf32>
    %c0_7 = arith.constant 0 : index
    %c0_8 = arith.constant 0 : index
    %12 = vector.load %arg5[%c0_7, %c0_8] : memref<1x32xf32, #tpu.memory_space<vmem>>, vector<1x32xf32>
    %cst_9 = arith.constant dense<0.000000e+00> : vector<16xf32>
    %13 = vector.multi_reduction <add>, %10, %cst_9 [1] : vector<16x32xf32> to vector<16xf32>
    %14 = vector.shape_cast %13 : vector<16xf32> to vector<16x1xf32>
    %cst_10 = arith.constant 3.200000e+01 : f32
    %15 = vector.broadcast %cst_10 : f32 to vector<16x1xf32>
    %16 = arith.divf %14, %15 : vector<16x1xf32>
    %17 = vector.broadcast %16 : vector<16x1xf32> to vector<16x32xf32>
    %18 = arith.subf %10, %17 : vector<16x32xf32>
    %19 = arith.mulf %18, %18 : vector<16x32xf32>
    %cst_11 = arith.constant dense<0.000000e+00> : vector<16xf32>
    %20 = vector.multi_reduction <add>, %19, %cst_11 [1] : vector<16x32xf32> to vector<16xf32>
    %21 = vector.shape_cast %20 : vector<16xf32> to vector<16x1xf32>
    %cst_12 = arith.constant 3.200000e+01 : f32
    %22 = vector.broadcast %cst_12 : f32 to vector<16x1xf32>
    %23 = arith.divf %21, %22 : vector<16x1xf32>
    %24 = vector.broadcast %16 : vector<16x1xf32> to vector<16x32xf32>
    %25 = arith.subf %10, %24 : vector<16x32xf32>
    %cst_13 = arith.constant 9.99999996E-13 : f32
    %26 = vector.broadcast %cst_13 : f32 to vector<16x1xf32>
    %27 = arith.addf %23, %26 : vector<16x1xf32>
    %28 = math.rsqrt %27 : vector<16x1xf32>
    %29 = vector.broadcast %28 : vector<16x1xf32> to vector<16x32xf32>
    %30 = arith.mulf %25, %29 : vector<16x32xf32>
    %31 = vector.broadcast %11 : vector<1x32xf32> to vector<16x32xf32>
    %32 = arith.mulf %30, %31 : vector<16x32xf32>
    %33 = vector.broadcast %12 : vector<1x32xf32> to vector<16x32xf32>
    %34 = arith.addf %32, %33 : vector<16x32xf32>
    %c0_14 = arith.constant 0 : index
    %c0_15 = arith.constant 0 : index
    %35 = vector.load %arg1[%c0_14, %c0_15] : memref<2x8xf32, #tpu.memory_space<vmem>>, vector<2x8xf32>
    %cst_16 = arith.constant 1.000000e+00 : f32
    %36 = vector.broadcast %cst_16 : f32 to vector<2x8xf32>
    %37 = arith.subf %36, %35 : vector<2x8xf32>
    %38 = vector.shape_cast %37 : vector<2x8xf32> to vector<2x1x8xf32>
    %cst_17 = arith.constant -1.000000e+09 : f32
    %39 = vector.broadcast %cst_17 : f32 to vector<2x1x8xf32>
    %40 = arith.mulf %38, %39 : vector<2x1x8xf32>
    %c0_18 = arith.constant 0 : index
    %c0_19 = arith.constant 0 : index
    %c0_20 = arith.constant 0 : index
    %41 = vector.load %arg6[%c0_18, %c0_19, %c0_20] : memref<2x32x96xf32, #tpu.memory_space<vmem>>, vector<1x32x96xf32>
    %42 = vector.shape_cast %41 : vector<1x32x96xf32> to vector<32x96xf32>
    %cst_21 = arith.constant dense<0.000000e+00> : vector<16x96xf32>
    %43 = tpu.matmul %34, %42, %cst_21 {dimension_numbers = #tpu.dot_dimension_numbers<[1], [0], [0], [1], [0, 0, 1, 1], [], []>} : vector<16x32xf32>, vector<32x96xf32>, vector<16x96xf32> -> vector<16x96xf32>
    %c0_22 = arith.constant 0 : index
    %c0_23 = arith.constant 0 : index
    %c0_24 = arith.constant 0 : index
    %44 = vector.load %arg7[%c0_22, %c0_23, %c0_24] : memref<2x1x96xf32, #tpu.memory_space<vmem>>, vector<1x1x96xf32>
    %45 = vector.shape_cast %44 : vector<1x1x96xf32> to vector<1x96xf32>
    %46 = vector.broadcast %45 : vector<1x96xf32> to vector<16x96xf32>
    %47 = arith.addf %43, %46 : vector<16x96xf32>
    %48 = vector.shape_cast %47 : vector<16x96xf32> to vector<2x8x96xf32>
    %c0_25 = arith.constant 0 : index
    %c0_26 = arith.constant 0 : index
    %c0_27 = arith.constant 0 : index
    %c0_28 = arith.constant 0 : index
    %49 = vector.load %arg8[%c0_25, %c0_26, %c0_27, %c0_28] : memref<2x2x16x32xf32, #tpu.memory_space<vmem>>, vector<1x2x16x32xf32>
    %50 = vector.shape_cast %49 : vector<1x2x16x32xf32> to vector<2x16x32xf32>
    %cst_29 = arith.constant 0.000000e+00 : f32
    %51 = vector.broadcast %cst_29 : f32 to vector<16x32xf32>
    %52 = vector.extract_strided_slice %48 {offsets = [0, 0, 0], sizes = [2, 8, 16], strides = [1, 1, 1]} : vector<2x8x96xf32> to vector<2x8x16xf32>
    %cst_30 = arith.constant 2.500000e-01 : f32
    %53 = vector.broadcast %cst_30 : f32 to vector<2x8x16xf32>
    %54 = arith.mulf %52, %53 : vector<2x8x16xf32>
    %55 = vector.extract_strided_slice %48 {offsets = [0, 0, 32], sizes = [2, 8, 16], strides = [1, 1, 1]} : vector<2x8x96xf32> to vector<2x8x16xf32>
    %56 = vector.extract_strided_slice %48 {offsets = [0, 0, 64], sizes = [2, 8, 16], strides = [1, 1, 1]} : vector<2x8x96xf32> to vector<2x8x16xf32>
    "tpu.trace_start"() <{level = 10 : i32, message = "bqd,bkd->bqk"}> : () -> ()
    %cst_31 = arith.constant dense<0.000000e+00> : vector<2x8x8xf32>
    %57 = tpu.matmul %54, %55, %cst_31 {dimension_numbers = #tpu.dot_dimension_numbers<[2], [2], [1], [1], [0, 0, 0, 1, 1, 1], [0], [0]>} : vector<2x8x16xf32>, vector<2x8x16xf32>, vector<2x8x8xf32> -> vector<2x8x8xf32>
    "tpu.trace_stop"() : () -> ()
    %58 = vector.broadcast %40 : vector<2x1x8xf32> to vector<2x8x8xf32>
    %59 = arith.addf %57, %58 : vector<2x8x8xf32>
    %cst_32 = arith.constant dense<0xFF800000> : vector<2x8xf32>
    %60 = vector.multi_reduction <maximumf>, %59, %cst_32 [2] : vector<2x8x8xf32> to vector<2x8xf32>
    %61 = vector.shape_cast %60 : vector<2x8xf32> to vector<2x8x1xf32>
    %62 = vector.broadcast %61 : vector<2x8x1xf32> to vector<2x8x8xf32>
    %63 = arith.subf %59, %62 : vector<2x8x8xf32>
    %64 = math.exp %63 : vector<2x8x8xf32>
    %cst_33 = arith.constant dense<0.000000e+00> : vector<2x8xf32>
    %65 = vector.multi_reduction <add>, %64, %cst_33 [2] : vector<2x8x8xf32> to vector<2x8xf32>
    %66 = vector.shape_cast %65 : vector<2x8xf32> to vector<2x8x1xf32>
    %67 = tpu.reciprocal %66 {approx = true} : vector<2x8x1xf32> -> vector<2x8x1xf32>
    %68 = vector.broadcast %67 : vector<2x8x1xf32> to vector<2x8x8xf32>
    %69 = arith.mulf %64, %68 : vector<2x8x8xf32>
    "tpu.trace_start"() <{level = 10 : i32, message = "bqk,bkd->bqd"}> : () -> ()
    %cst_34 = arith.constant dense<0.000000e+00> : vector<2x8x16xf32>
    %70 = tpu.matmul %69, %56, %cst_34 {dimension_numbers = #tpu.dot_dimension_numbers<[2], [1], [1], [2], [0, 0, 0, 1, 1, 2], [0], [0]>} : vector<2x8x8xf32>, vector<2x8x16xf32>, vector<2x8x16xf32> -> vector<2x8x16xf32>
    "tpu.trace_stop"() : () -> ()
    %71 = vector.shape_cast %70 : vector<2x8x16xf32> to vector<16x16xf32>
    %72 = vector.extract_strided_slice %50 {offsets = [0, 0, 0], sizes = [1, 16, 32], strides = [1, 1, 1]} : vector<2x16x32xf32> to vector<1x16x32xf32>
    %73 = vector.shape_cast %72 : vector<1x16x32xf32> to vector<16x32xf32>
    %cst_35 = arith.constant dense<0.000000e+00> : vector<16x32xf32>
    %74 = tpu.matmul %71, %73, %cst_35 {dimension_numbers = #tpu.dot_dimension_numbers<[1], [0], [0], [1], [0, 0, 1, 1], [], []>} : vector<16x16xf32>, vector<16x32xf32>, vector<16x32xf32> -> vector<16x32xf32>
    %75 = arith.addf %51, %74 : vector<16x32xf32>
    %76 = vector.extract_strided_slice %48 {offsets = [0, 0, 16], sizes = [2, 8, 16], strides = [1, 1, 1]} : vector<2x8x96xf32> to vector<2x8x16xf32>
    %cst_36 = arith.constant 2.500000e-01 : f32
    %77 = vector.broadcast %cst_36 : f32 to vector<2x8x16xf32>
    %78 = arith.mulf %76, %77 : vector<2x8x16xf32>
    %79 = vector.extract_strided_slice %48 {offsets = [0, 0, 48], sizes = [2, 8, 16], strides = [1, 1, 1]} : vector<2x8x96xf32> to vector<2x8x16xf32>
    %80 = vector.extract_strided_slice %48 {offsets = [0, 0, 80], sizes = [2, 8, 16], strides = [1, 1, 1]} : vector<2x8x96xf32> to vector<2x8x16xf32>
    "tpu.trace_start"() <{level = 10 : i32, message = "bqd,bkd->bqk"}> : () -> ()
    %cst_37 = arith.constant dense<0.000000e+00> : vector<2x8x8xf32>
    %81 = tpu.matmul %78, %79, %cst_37 {dimension_numbers = #tpu.dot_dimension_numbers<[2], [2], [1], [1], [0, 0, 0, 1, 1, 1], [0], [0]>} : vector<2x8x16xf32>, vector<2x8x16xf32>, vector<2x8x8xf32> -> vector<2x8x8xf32>
    "tpu.trace_stop"() : () -> ()
    %82 = vector.broadcast %40 : vector<2x1x8xf32> to vector<2x8x8xf32>
    %83 = arith.addf %81, %82 : vector<2x8x8xf32>
    %cst_38 = arith.constant dense<0xFF800000> : vector<2x8xf32>
    %84 = vector.multi_reduction <maximumf>, %83, %cst_38 [2] : vector<2x8x8xf32> to vector<2x8xf32>
    %85 = vector.shape_cast %84 : vector<2x8xf32> to vector<2x8x1xf32>
    %86 = vector.broadcast %85 : vector<2x8x1xf32> to vector<2x8x8xf32>
    %87 = arith.subf %83, %86 : vector<2x8x8xf32>
    %88 = math.exp %87 : vector<2x8x8xf32>
    %cst_39 = arith.constant dense<0.000000e+00> : vector<2x8xf32>
    %89 = vector.multi_reduction <add>, %88, %cst_39 [2] : vector<2x8x8xf32> to vector<2x8xf32>
    %90 = vector.shape_cast %89 : vector<2x8xf32> to vector<2x8x1xf32>
    %91 = tpu.reciprocal %90 {approx = true} : vector<2x8x1xf32> -> vector<2x8x1xf32>
    %92 = vector.broadcast %91 : vector<2x8x1xf32> to vector<2x8x8xf32>
    %93 = arith.mulf %88, %92 : vector<2x8x8xf32>
    "tpu.trace_start"() <{level = 10 : i32, message = "bqk,bkd->bqd"}> : () -> ()
    %cst_40 = arith.constant dense<0.000000e+00> : vector<2x8x16xf32>
    %94 = tpu.matmul %93, %80, %cst_40 {dimension_numbers = #tpu.dot_dimension_numbers<[2], [1], [1], [2], [0, 0, 0, 1, 1, 2], [0], [0]>} : vector<2x8x8xf32>, vector<2x8x16xf32>, vector<2x8x16xf32> -> vector<2x8x16xf32>
    "tpu.trace_stop"() : () -> ()
    %95 = vector.shape_cast %94 : vector<2x8x16xf32> to vector<16x16xf32>
    %96 = vector.extract_strided_slice %50 {offsets = [1, 0, 0], sizes = [1, 16, 32], strides = [1, 1, 1]} : vector<2x16x32xf32> to vector<1x16x32xf32>
    %97 = vector.shape_cast %96 : vector<1x16x32xf32> to vector<16x32xf32>
    %cst_41 = arith.constant dense<0.000000e+00> : vector<16x32xf32>
    %98 = tpu.matmul %95, %97, %cst_41 {dimension_numbers = #tpu.dot_dimension_numbers<[1], [0], [0], [1], [0, 0, 1, 1], [], []>} : vector<16x16xf32>, vector<16x32xf32>, vector<16x32xf32> -> vector<16x32xf32>
    %99 = arith.addf %75, %98 : vector<16x32xf32>
    %c0_42 = arith.constant 0 : index
    %c0_43 = arith.constant 0 : index
    %c0_44 = arith.constant 0 : index
    %100 = vector.load %arg9[%c0_42, %c0_43, %c0_44] : memref<2x1x32xf32, #tpu.memory_space<vmem>>, vector<1x1x32xf32>
    %101 = vector.shape_cast %100 : vector<1x1x32xf32> to vector<1x32xf32>
    %102 = vector.broadcast %101 : vector<1x32xf32> to vector<16x32xf32>
    %103 = arith.addf %99, %102 : vector<16x32xf32>
    %104 = arith.addf %34, %103 : vector<16x32xf32>
    %c0_45 = arith.constant 0 : index
    %c0_46 = arith.constant 0 : index
    %c0_47 = arith.constant 0 : index
    %105 = vector.load %arg10[%c0_45, %c0_46, %c0_47] : memref<2x1x32xf32, #tpu.memory_space<vmem>>, vector<1x1x32xf32>
    %106 = vector.shape_cast %105 : vector<1x1x32xf32> to vector<1x32xf32>
    %c0_48 = arith.constant 0 : index
    %c0_49 = arith.constant 0 : index
    %c0_50 = arith.constant 0 : index
    %107 = vector.load %arg11[%c0_48, %c0_49, %c0_50] : memref<2x1x32xf32, #tpu.memory_space<vmem>>, vector<1x1x32xf32>
    %108 = vector.shape_cast %107 : vector<1x1x32xf32> to vector<1x32xf32>
    %cst_51 = arith.constant dense<0.000000e+00> : vector<16xf32>
    %109 = vector.multi_reduction <add>, %104, %cst_51 [1] : vector<16x32xf32> to vector<16xf32>
    %110 = vector.shape_cast %109 : vector<16xf32> to vector<16x1xf32>
    %cst_52 = arith.constant 3.200000e+01 : f32
    %111 = vector.broadcast %cst_52 : f32 to vector<16x1xf32>
    %112 = arith.divf %110, %111 : vector<16x1xf32>
    %113 = vector.broadcast %112 : vector<16x1xf32> to vector<16x32xf32>
    %114 = arith.subf %104, %113 : vector<16x32xf32>
    %115 = arith.mulf %114, %114 : vector<16x32xf32>
    %cst_53 = arith.constant dense<0.000000e+00> : vector<16xf32>
    %116 = vector.multi_reduction <add>, %115, %cst_53 [1] : vector<16x32xf32> to vector<16xf32>
    %117 = vector.shape_cast %116 : vector<16xf32> to vector<16x1xf32>
    %cst_54 = arith.constant 3.200000e+01 : f32
    %118 = vector.broadcast %cst_54 : f32 to vector<16x1xf32>
    %119 = arith.divf %117, %118 : vector<16x1xf32>
    %120 = vector.broadcast %112 : vector<16x1xf32> to vector<16x32xf32>
    %121 = arith.subf %104, %120 : vector<16x32xf32>
    %cst_55 = arith.constant 9.99999996E-13 : f32
    %122 = vector.broadcast %cst_55 : f32 to vector<16x1xf32>
    %123 = arith.addf %119, %122 : vector<16x1xf32>
    %124 = math.rsqrt %123 : vector<16x1xf32>
    %125 = vector.broadcast %124 : vector<16x1xf32> to vector<16x32xf32>
    %126 = arith.mulf %121, %125 : vector<16x32xf32>
    %127 = vector.broadcast %106 : vector<1x32xf32> to vector<16x32xf32>
    %128 = arith.mulf %126, %127 : vector<16x32xf32>
    %129 = vector.broadcast %108 : vector<1x32xf32> to vector<16x32xf32>
    %130 = arith.addf %128, %129 : vector<16x32xf32>
    %c0_56 = arith.constant 0 : index
    %c0_57 = arith.constant 0 : index
    %c0_58 = arith.constant 0 : index
    %131 = vector.load %arg12[%c0_56, %c0_57, %c0_58] : memref<2x32x64xf32, #tpu.memory_space<vmem>>, vector<1x32x64xf32>
    %132 = vector.shape_cast %131 : vector<1x32x64xf32> to vector<32x64xf32>
    %cst_59 = arith.constant dense<0.000000e+00> : vector<16x64xf32>
    %133 = tpu.matmul %130, %132, %cst_59 {dimension_numbers = #tpu.dot_dimension_numbers<[1], [0], [0], [1], [0, 0, 1, 1], [], []>} : vector<16x32xf32>, vector<32x64xf32>, vector<16x64xf32> -> vector<16x64xf32>
    %c0_60 = arith.constant 0 : index
    %c0_61 = arith.constant 0 : index
    %c0_62 = arith.constant 0 : index
    %134 = vector.load %arg13[%c0_60, %c0_61, %c0_62] : memref<2x1x64xf32, #tpu.memory_space<vmem>>, vector<1x1x64xf32>
    %135 = vector.shape_cast %134 : vector<1x1x64xf32> to vector<1x64xf32>
    %136 = vector.broadcast %135 : vector<1x64xf32> to vector<16x64xf32>
    %137 = arith.addf %133, %136 : vector<16x64xf32>
    %cst_63 = arith.constant 5.000000e-01 : f32
    %138 = vector.broadcast %cst_63 : f32 to vector<16x64xf32>
    %139 = arith.mulf %138, %137 : vector<16x64xf32>
    %cst_64 = arith.constant 4.471500e-02 : f32
    %140 = vector.broadcast %cst_64 : f32 to vector<16x64xf32>
    %141 = arith.mulf %140, %137 : vector<16x64xf32>
    %142 = arith.mulf %141, %137 : vector<16x64xf32>
    %143 = arith.mulf %142, %137 : vector<16x64xf32>
    %144 = arith.addf %137, %143 : vector<16x64xf32>
    %cst_65 = arith.constant 0.797884583 : f32
    %145 = vector.broadcast %cst_65 : f32 to vector<16x64xf32>
    %146 = arith.mulf %145, %144 : vector<16x64xf32>
    %147 = math.tanh %146 : vector<16x64xf32>
    %cst_66 = arith.constant 1.000000e+00 : f32
    %148 = vector.broadcast %cst_66 : f32 to vector<16x64xf32>
    %149 = arith.addf %148, %147 : vector<16x64xf32>
    %150 = arith.mulf %139, %149 : vector<16x64xf32>
    %c0_67 = arith.constant 0 : index
    %c0_68 = arith.constant 0 : index
    %c0_69 = arith.constant 0 : index
    %151 = vector.load %arg14[%c0_67, %c0_68, %c0_69] : memref<2x64x32xf32, #tpu.memory_space<vmem>>, vector<1x64x32xf32>
    %152 = vector.shape_cast %151 : vector<1x64x32xf32> to vector<64x32xf32>
    %cst_70 = arith.constant dense<0.000000e+00> : vector<16x32xf32>
    %153 = tpu.matmul %150, %152, %cst_70 {dimension_numbers = #tpu.dot_dimension_numbers<[1], [0], [0], [1], [0, 0, 1, 1], [], []>} : vector<16x64xf32>, vector<64x32xf32>, vector<16x32xf32> -> vector<16x32xf32>
    %c0_71 = arith.constant 0 : index
    %c0_72 = arith.constant 0 : index
    %c0_73 = arith.constant 0 : index
    %154 = vector.load %arg15[%c0_71, %c0_72, %c0_73] : memref<2x1x32xf32, #tpu.memory_space<vmem>>, vector<1x1x32xf32>
    %155 = vector.shape_cast %154 : vector<1x1x32xf32> to vector<1x32xf32>
    %156 = vector.broadcast %155 : vector<1x32xf32> to vector<16x32xf32>
    %157 = arith.addf %153, %156 : vector<16x32xf32>
    %158 = arith.addf %130, %157 : vector<16x32xf32>
    %c0_74 = arith.constant 0 : index
    %c0_75 = arith.constant 0 : index
    %c0_76 = arith.constant 0 : index
    %159 = vector.load %arg16[%c0_74, %c0_75, %c0_76] : memref<2x1x32xf32, #tpu.memory_space<vmem>>, vector<1x1x32xf32>
    %160 = vector.shape_cast %159 : vector<1x1x32xf32> to vector<1x32xf32>
    %c0_77 = arith.constant 0 : index
    %c0_78 = arith.constant 0 : index
    %c0_79 = arith.constant 0 : index
    %161 = vector.load %arg17[%c0_77, %c0_78, %c0_79] : memref<2x1x32xf32, #tpu.memory_space<vmem>>, vector<1x1x32xf32>
    %162 = vector.shape_cast %161 : vector<1x1x32xf32> to vector<1x32xf32>
    %cst_80 = arith.constant dense<0.000000e+00> : vector<16xf32>
    %163 = vector.multi_reduction <add>, %158, %cst_80 [1] : vector<16x32xf32> to vector<16xf32>
    %164 = vector.shape_cast %163 : vector<16xf32> to vector<16x1xf32>
    %cst_81 = arith.constant 3.200000e+01 : f32
    %165 = vector.broadcast %cst_81 : f32 to vector<16x1xf32>
    %166 = arith.divf %164, %165 : vector<16x1xf32>
    %167 = vector.broadcast %166 : vector<16x1xf32> to vector<16x32xf32>
    %168 = arith.subf %158, %167 : vector<16x32xf32>
    %169 = arith.mulf %168, %168 : vector<16x32xf32>
    %cst_82 = arith.constant dense<0.000000e+00> : vector<16xf32>
    %170 = vector.multi_reduction <add>, %169, %cst_82 [1] : vector<16x32xf32> to vector<16xf32>
    %171 = vector.shape_cast %170 : vector<16xf32> to vector<16x1xf32>
    %cst_83 = arith.constant 3.200000e+01 : f32
    %172 = vector.broadcast %cst_83 : f32 to vector<16x1xf32>
    %173 = arith.divf %171, %172 : vector<16x1xf32>
    %174 = vector.broadcast %166 : vector<16x1xf32> to vector<16x32xf32>
    %175 = arith.subf %158, %174 : vector<16x32xf32>
    %cst_84 = arith.constant 9.99999996E-13 : f32
    %176 = vector.broadcast %cst_84 : f32 to vector<16x1xf32>
    %177 = arith.addf %173, %176 : vector<16x1xf32>
    %178 = math.rsqrt %177 : vector<16x1xf32>
    %179 = vector.broadcast %178 : vector<16x1xf32> to vector<16x32xf32>
    %180 = arith.mulf %175, %179 : vector<16x32xf32>
    %181 = vector.broadcast %160 : vector<1x32xf32> to vector<16x32xf32>
    %182 = arith.mulf %180, %181 : vector<16x32xf32>
    %183 = vector.broadcast %162 : vector<1x32xf32> to vector<16x32xf32>
    %184 = arith.addf %182, %183 : vector<16x32xf32>
    %c1 = arith.constant 1 : index
    %c0_85 = arith.constant 0 : index
    %c0_86 = arith.constant 0 : index
    %185 = vector.load %arg6[%c1, %c0_85, %c0_86] : memref<2x32x96xf32, #tpu.memory_space<vmem>>, vector<1x32x96xf32>
    %186 = vector.shape_cast %185 : vector<1x32x96xf32> to vector<32x96xf32>
    %cst_87 = arith.constant dense<0.000000e+00> : vector<16x96xf32>
    %187 = tpu.matmul %184, %186, %cst_87 {dimension_numbers = #tpu.dot_dimension_numbers<[1], [0], [0], [1], [0, 0, 1, 1], [], []>} : vector<16x32xf32>, vector<32x96xf32>, vector<16x96xf32> -> vector<16x96xf32>
    %c1_88 = arith.constant 1 : index
    %c0_89 = arith.constant 0 : index
    %c0_90 = arith.constant 0 : index
    %188 = vector.load %arg7[%c1_88, %c0_89, %c0_90] : memref<2x1x96xf32, #tpu.memory_space<vmem>>, vector<1x1x96xf32>
    %189 = vector.shape_cast %188 : vector<1x1x96xf32> to vector<1x96xf32>
    %190 = vector.broadcast %189 : vector<1x96xf32> to vector<16x96xf32>
    %191 = arith.addf %187, %190 : vector<16x96xf32>
    %192 = vector.shape_cast %191 : vector<16x96xf32> to vector<2x8x96xf32>
    %c1_91 = arith.constant 1 : index
    %c0_92 = arith.constant 0 : index
    %c0_93 = arith.constant 0 : index
    %c0_94 = arith.constant 0 : index
    %193 = vector.load %arg8[%c1_91, %c0_92, %c0_93, %c0_94] : memref<2x2x16x32xf32, #tpu.memory_space<vmem>>, vector<1x2x16x32xf32>
    %194 = vector.shape_cast %193 : vector<1x2x16x32xf32> to vector<2x16x32xf32>
    %cst_95 = arith.constant 0.000000e+00 : f32
    %195 = vector.broadcast %cst_95 : f32 to vector<16x32xf32>
    %196 = vector.extract_strided_slice %192 {offsets = [0, 0, 0], sizes = [2, 8, 16], strides = [1, 1, 1]} : vector<2x8x96xf32> to vector<2x8x16xf32>
    %cst_96 = arith.constant 2.500000e-01 : f32
    %197 = vector.broadcast %cst_96 : f32 to vector<2x8x16xf32>
    %198 = arith.mulf %196, %197 : vector<2x8x16xf32>
    %199 = vector.extract_strided_slice %192 {offsets = [0, 0, 32], sizes = [2, 8, 16], strides = [1, 1, 1]} : vector<2x8x96xf32> to vector<2x8x16xf32>
    %200 = vector.extract_strided_slice %192 {offsets = [0, 0, 64], sizes = [2, 8, 16], strides = [1, 1, 1]} : vector<2x8x96xf32> to vector<2x8x16xf32>
    "tpu.trace_start"() <{level = 10 : i32, message = "bqd,bkd->bqk"}> : () -> ()
    %cst_97 = arith.constant dense<0.000000e+00> : vector<2x8x8xf32>
    %201 = tpu.matmul %198, %199, %cst_97 {dimension_numbers = #tpu.dot_dimension_numbers<[2], [2], [1], [1], [0, 0, 0, 1, 1, 1], [0], [0]>} : vector<2x8x16xf32>, vector<2x8x16xf32>, vector<2x8x8xf32> -> vector<2x8x8xf32>
    "tpu.trace_stop"() : () -> ()
    %202 = vector.broadcast %40 : vector<2x1x8xf32> to vector<2x8x8xf32>
    %203 = arith.addf %201, %202 : vector<2x8x8xf32>
    %cst_98 = arith.constant dense<0xFF800000> : vector<2x8xf32>
    %204 = vector.multi_reduction <maximumf>, %203, %cst_98 [2] : vector<2x8x8xf32> to vector<2x8xf32>
    %205 = vector.shape_cast %204 : vector<2x8xf32> to vector<2x8x1xf32>
    %206 = vector.broadcast %205 : vector<2x8x1xf32> to vector<2x8x8xf32>
    %207 = arith.subf %203, %206 : vector<2x8x8xf32>
    %208 = math.exp %207 : vector<2x8x8xf32>
    %cst_99 = arith.constant dense<0.000000e+00> : vector<2x8xf32>
    %209 = vector.multi_reduction <add>, %208, %cst_99 [2] : vector<2x8x8xf32> to vector<2x8xf32>
    %210 = vector.shape_cast %209 : vector<2x8xf32> to vector<2x8x1xf32>
    %211 = tpu.reciprocal %210 {approx = true} : vector<2x8x1xf32> -> vector<2x8x1xf32>
    %212 = vector.broadcast %211 : vector<2x8x1xf32> to vector<2x8x8xf32>
    %213 = arith.mulf %208, %212 : vector<2x8x8xf32>
    "tpu.trace_start"() <{level = 10 : i32, message = "bqk,bkd->bqd"}> : () -> ()
    %cst_100 = arith.constant dense<0.000000e+00> : vector<2x8x16xf32>
    %214 = tpu.matmul %213, %200, %cst_100 {dimension_numbers = #tpu.dot_dimension_numbers<[2], [1], [1], [2], [0, 0, 0, 1, 1, 2], [0], [0]>} : vector<2x8x8xf32>, vector<2x8x16xf32>, vector<2x8x16xf32> -> vector<2x8x16xf32>
    "tpu.trace_stop"() : () -> ()
    %215 = vector.shape_cast %214 : vector<2x8x16xf32> to vector<16x16xf32>
    %216 = vector.extract_strided_slice %194 {offsets = [0, 0, 0], sizes = [1, 16, 32], strides = [1, 1, 1]} : vector<2x16x32xf32> to vector<1x16x32xf32>
    %217 = vector.shape_cast %216 : vector<1x16x32xf32> to vector<16x32xf32>
    %cst_101 = arith.constant dense<0.000000e+00> : vector<16x32xf32>
    %218 = tpu.matmul %215, %217, %cst_101 {dimension_numbers = #tpu.dot_dimension_numbers<[1], [0], [0], [1], [0, 0, 1, 1], [], []>} : vector<16x16xf32>, vector<16x32xf32>, vector<16x32xf32> -> vector<16x32xf32>
    %219 = arith.addf %195, %218 : vector<16x32xf32>
    %220 = vector.extract_strided_slice %192 {offsets = [0, 0, 16], sizes = [2, 8, 16], strides = [1, 1, 1]} : vector<2x8x96xf32> to vector<2x8x16xf32>
    %cst_102 = arith.constant 2.500000e-01 : f32
    %221 = vector.broadcast %cst_102 : f32 to vector<2x8x16xf32>
    %222 = arith.mulf %220, %221 : vector<2x8x16xf32>
    %223 = vector.extract_strided_slice %192 {offsets = [0, 0, 48], sizes = [2, 8, 16], strides = [1, 1, 1]} : vector<2x8x96xf32> to vector<2x8x16xf32>
    %224 = vector.extract_strided_slice %192 {offsets = [0, 0, 80], sizes = [2, 8, 16], strides = [1, 1, 1]} : vector<2x8x96xf32> to vector<2x8x16xf32>
    "tpu.trace_start"() <{level = 10 : i32, message = "bqd,bkd->bqk"}> : () -> ()
    %cst_103 = arith.constant dense<0.000000e+00> : vector<2x8x8xf32>
    %225 = tpu.matmul %222, %223, %cst_103 {dimension_numbers = #tpu.dot_dimension_numbers<[2], [2], [1], [1], [0, 0, 0, 1, 1, 1], [0], [0]>} : vector<2x8x16xf32>, vector<2x8x16xf32>, vector<2x8x8xf32> -> vector<2x8x8xf32>
    "tpu.trace_stop"() : () -> ()
    %226 = vector.broadcast %40 : vector<2x1x8xf32> to vector<2x8x8xf32>
    %227 = arith.addf %225, %226 : vector<2x8x8xf32>
    %cst_104 = arith.constant dense<0xFF800000> : vector<2x8xf32>
    %228 = vector.multi_reduction <maximumf>, %227, %cst_104 [2] : vector<2x8x8xf32> to vector<2x8xf32>
    %229 = vector.shape_cast %228 : vector<2x8xf32> to vector<2x8x1xf32>
    %230 = vector.broadcast %229 : vector<2x8x1xf32> to vector<2x8x8xf32>
    %231 = arith.subf %227, %230 : vector<2x8x8xf32>
    %232 = math.exp %231 : vector<2x8x8xf32>
    %cst_105 = arith.constant dense<0.000000e+00> : vector<2x8xf32>
    %233 = vector.multi_reduction <add>, %232, %cst_105 [2] : vector<2x8x8xf32> to vector<2x8xf32>
    %234 = vector.shape_cast %233 : vector<2x8xf32> to vector<2x8x1xf32>
    %235 = tpu.reciprocal %234 {approx = true} : vector<2x8x1xf32> -> vector<2x8x1xf32>
    %236 = vector.broadcast %235 : vector<2x8x1xf32> to vector<2x8x8xf32>
    %237 = arith.mulf %232, %236 : vector<2x8x8xf32>
    "tpu.trace_start"() <{level = 10 : i32, message = "bqk,bkd->bqd"}> : () -> ()
    %cst_106 = arith.constant dense<0.000000e+00> : vector<2x8x16xf32>
    %238 = tpu.matmul %237, %224, %cst_106 {dimension_numbers = #tpu.dot_dimension_numbers<[2], [1], [1], [2], [0, 0, 0, 1, 1, 2], [0], [0]>} : vector<2x8x8xf32>, vector<2x8x16xf32>, vector<2x8x16xf32> -> vector<2x8x16xf32>
    "tpu.trace_stop"() : () -> ()
    %239 = vector.shape_cast %238 : vector<2x8x16xf32> to vector<16x16xf32>
    %240 = vector.extract_strided_slice %194 {offsets = [1, 0, 0], sizes = [1, 16, 32], strides = [1, 1, 1]} : vector<2x16x32xf32> to vector<1x16x32xf32>
    %241 = vector.shape_cast %240 : vector<1x16x32xf32> to vector<16x32xf32>
    %cst_107 = arith.constant dense<0.000000e+00> : vector<16x32xf32>
    %242 = tpu.matmul %239, %241, %cst_107 {dimension_numbers = #tpu.dot_dimension_numbers<[1], [0], [0], [1], [0, 0, 1, 1], [], []>} : vector<16x16xf32>, vector<16x32xf32>, vector<16x32xf32> -> vector<16x32xf32>
    %243 = arith.addf %219, %242 : vector<16x32xf32>
    %c1_108 = arith.constant 1 : index
    %c0_109 = arith.constant 0 : index
    %c0_110 = arith.constant 0 : index
    %244 = vector.load %arg9[%c1_108, %c0_109, %c0_110] : memref<2x1x32xf32, #tpu.memory_space<vmem>>, vector<1x1x32xf32>
    %245 = vector.shape_cast %244 : vector<1x1x32xf32> to vector<1x32xf32>
    %246 = vector.broadcast %245 : vector<1x32xf32> to vector<16x32xf32>
    %247 = arith.addf %243, %246 : vector<16x32xf32>
    %248 = arith.addf %184, %247 : vector<16x32xf32>
    %c1_111 = arith.constant 1 : index
    %c0_112 = arith.constant 0 : index
    %c0_113 = arith.constant 0 : index
    %249 = vector.load %arg10[%c1_111, %c0_112, %c0_113] : memref<2x1x32xf32, #tpu.memory_space<vmem>>, vector<1x1x32xf32>
    %250 = vector.shape_cast %249 : vector<1x1x32xf32> to vector<1x32xf32>
    %c1_114 = arith.constant 1 : index
    %c0_115 = arith.constant 0 : index
    %c0_116 = arith.constant 0 : index
    %251 = vector.load %arg11[%c1_114, %c0_115, %c0_116] : memref<2x1x32xf32, #tpu.memory_space<vmem>>, vector<1x1x32xf32>
    %252 = vector.shape_cast %251 : vector<1x1x32xf32> to vector<1x32xf32>
    %cst_117 = arith.constant dense<0.000000e+00> : vector<16xf32>
    %253 = vector.multi_reduction <add>, %248, %cst_117 [1] : vector<16x32xf32> to vector<16xf32>
    %254 = vector.shape_cast %253 : vector<16xf32> to vector<16x1xf32>
    %cst_118 = arith.constant 3.200000e+01 : f32
    %255 = vector.broadcast %cst_118 : f32 to vector<16x1xf32>
    %256 = arith.divf %254, %255 : vector<16x1xf32>
    %257 = vector.broadcast %256 : vector<16x1xf32> to vector<16x32xf32>
    %258 = arith.subf %248, %257 : vector<16x32xf32>
    %259 = arith.mulf %258, %258 : vector<16x32xf32>
    %cst_119 = arith.constant dense<0.000000e+00> : vector<16xf32>
    %260 = vector.multi_reduction <add>, %259, %cst_119 [1] : vector<16x32xf32> to vector<16xf32>
    %261 = vector.shape_cast %260 : vector<16xf32> to vector<16x1xf32>
    %cst_120 = arith.constant 3.200000e+01 : f32
    %262 = vector.broadcast %cst_120 : f32 to vector<16x1xf32>
    %263 = arith.divf %261, %262 : vector<16x1xf32>
    %264 = vector.broadcast %256 : vector<16x1xf32> to vector<16x32xf32>
    %265 = arith.subf %248, %264 : vector<16x32xf32>
    %cst_121 = arith.constant 9.99999996E-13 : f32
    %266 = vector.broadcast %cst_121 : f32 to vector<16x1xf32>
    %267 = arith.addf %263, %266 : vector<16x1xf32>
    %268 = math.rsqrt %267 : vector<16x1xf32>
    %269 = vector.broadcast %268 : vector<16x1xf32> to vector<16x32xf32>
    %270 = arith.mulf %265, %269 : vector<16x32xf32>
    %271 = vector.broadcast %250 : vector<1x32xf32> to vector<16x32xf32>
    %272 = arith.mulf %270, %271 : vector<16x32xf32>
    %273 = vector.broadcast %252 : vector<1x32xf32> to vector<16x32xf32>
    %274 = arith.addf %272, %273 : vector<16x32xf32>
    %c1_122 = arith.constant 1 : index
    %c0_123 = arith.constant 0 : index
    %c0_124 = arith.constant 0 : index
    %275 = vector.load %arg12[%c1_122, %c0_123, %c0_124] : memref<2x32x64xf32, #tpu.memory_space<vmem>>, vector<1x32x64xf32>
    %276 = vector.shape_cast %275 : vector<1x32x64xf32> to vector<32x64xf32>
    %cst_125 = arith.constant dense<0.000000e+00> : vector<16x64xf32>
    %277 = tpu.matmul %274, %276, %cst_125 {dimension_numbers = #tpu.dot_dimension_numbers<[1], [0], [0], [1], [0, 0, 1, 1], [], []>} : vector<16x32xf32>, vector<32x64xf32>, vector<16x64xf32> -> vector<16x64xf32>
    %c1_126 = arith.constant 1 : index
    %c0_127 = arith.constant 0 : index
    %c0_128 = arith.constant 0 : index
    %278 = vector.load %arg13[%c1_126, %c0_127, %c0_128] : memref<2x1x64xf32, #tpu.memory_space<vmem>>, vector<1x1x64xf32>
    %279 = vector.shape_cast %278 : vector<1x1x64xf32> to vector<1x64xf32>
    %280 = vector.broadcast %279 : vector<1x64xf32> to vector<16x64xf32>
    %281 = arith.addf %277, %280 : vector<16x64xf32>
    %cst_129 = arith.constant 5.000000e-01 : f32
    %282 = vector.broadcast %cst_129 : f32 to vector<16x64xf32>
    %283 = arith.mulf %282, %281 : vector<16x64xf32>
    %cst_130 = arith.constant 4.471500e-02 : f32
    %284 = vector.broadcast %cst_130 : f32 to vector<16x64xf32>
    %285 = arith.mulf %284, %281 : vector<16x64xf32>
    %286 = arith.mulf %285, %281 : vector<16x64xf32>
    %287 = arith.mulf %286, %281 : vector<16x64xf32>
    %288 = arith.addf %281, %287 : vector<16x64xf32>
    %cst_131 = arith.constant 0.797884583 : f32
    %289 = vector.broadcast %cst_131 : f32 to vector<16x64xf32>
    %290 = arith.mulf %289, %288 : vector<16x64xf32>
    %291 = math.tanh %290 : vector<16x64xf32>
    %cst_132 = arith.constant 1.000000e+00 : f32
    %292 = vector.broadcast %cst_132 : f32 to vector<16x64xf32>
    %293 = arith.addf %292, %291 : vector<16x64xf32>
    %294 = arith.mulf %283, %293 : vector<16x64xf32>
    %c1_133 = arith.constant 1 : index
    %c0_134 = arith.constant 0 : index
    %c0_135 = arith.constant 0 : index
    %295 = vector.load %arg14[%c1_133, %c0_134, %c0_135] : memref<2x64x32xf32, #tpu.memory_space<vmem>>, vector<1x64x32xf32>
    %296 = vector.shape_cast %295 : vector<1x64x32xf32> to vector<64x32xf32>
    %cst_136 = arith.constant dense<0.000000e+00> : vector<16x32xf32>
    %297 = tpu.matmul %294, %296, %cst_136 {dimension_numbers = #tpu.dot_dimension_numbers<[1], [0], [0], [1], [0, 0, 1, 1], [], []>} : vector<16x64xf32>, vector<64x32xf32>, vector<16x32xf32> -> vector<16x32xf32>
    %c1_137 = arith.constant 1 : index
    %c0_138 = arith.constant 0 : index
    %c0_139 = arith.constant 0 : index
    %298 = vector.load %arg15[%c1_137, %c0_138, %c0_139] : memref<2x1x32xf32, #tpu.memory_space<vmem>>, vector<1x1x32xf32>
    %299 = vector.shape_cast %298 : vector<1x1x32xf32> to vector<1x32xf32>
    %300 = vector.broadcast %299 : vector<1x32xf32> to vector<16x32xf32>
    %301 = arith.addf %297, %300 : vector<16x32xf32>
    %302 = arith.addf %274, %301 : vector<16x32xf32>
    %c1_140 = arith.constant 1 : index
    %c0_141 = arith.constant 0 : index
    %c0_142 = arith.constant 0 : index
    %303 = vector.load %arg16[%c1_140, %c0_141, %c0_142] : memref<2x1x32xf32, #tpu.memory_space<vmem>>, vector<1x1x32xf32>
    %304 = vector.shape_cast %303 : vector<1x1x32xf32> to vector<1x32xf32>
    %c1_143 = arith.constant 1 : index
    %c0_144 = arith.constant 0 : index
    %c0_145 = arith.constant 0 : index
    %305 = vector.load %arg17[%c1_143, %c0_144, %c0_145] : memref<2x1x32xf32, #tpu.memory_space<vmem>>, vector<1x1x32xf32>
    %306 = vector.shape_cast %305 : vector<1x1x32xf32> to vector<1x32xf32>
    %cst_146 = arith.constant dense<0.000000e+00> : vector<16xf32>
    %307 = vector.multi_reduction <add>, %302, %cst_146 [1] : vector<16x32xf32> to vector<16xf32>
    %308 = vector.shape_cast %307 : vector<16xf32> to vector<16x1xf32>
    %cst_147 = arith.constant 3.200000e+01 : f32
    %309 = vector.broadcast %cst_147 : f32 to vector<16x1xf32>
    %310 = arith.divf %308, %309 : vector<16x1xf32>
    %311 = vector.broadcast %310 : vector<16x1xf32> to vector<16x32xf32>
    %312 = arith.subf %302, %311 : vector<16x32xf32>
    %313 = arith.mulf %312, %312 : vector<16x32xf32>
    %cst_148 = arith.constant dense<0.000000e+00> : vector<16xf32>
    %314 = vector.multi_reduction <add>, %313, %cst_148 [1] : vector<16x32xf32> to vector<16xf32>
    %315 = vector.shape_cast %314 : vector<16xf32> to vector<16x1xf32>
    %cst_149 = arith.constant 3.200000e+01 : f32
    %316 = vector.broadcast %cst_149 : f32 to vector<16x1xf32>
    %317 = arith.divf %315, %316 : vector<16x1xf32>
    %318 = vector.broadcast %310 : vector<16x1xf32> to vector<16x32xf32>
    %319 = arith.subf %302, %318 : vector<16x32xf32>
    %cst_150 = arith.constant 9.99999996E-13 : f32
    %320 = vector.broadcast %cst_150 : f32 to vector<16x1xf32>
    %321 = arith.addf %317, %320 : vector<16x1xf32>
    %322 = math.rsqrt %321 : vector<16x1xf32>
    %323 = vector.broadcast %322 : vector<16x1xf32> to vector<16x32xf32>
    %324 = arith.mulf %319, %323 : vector<16x32xf32>
    %325 = vector.broadcast %304 : vector<1x32xf32> to vector<16x32xf32>
    %326 = arith.mulf %324, %325 : vector<16x32xf32>
    %327 = vector.broadcast %306 : vector<1x32xf32> to vector<16x32xf32>
    %328 = arith.addf %326, %327 : vector<16x32xf32>
    %329 = vector.shape_cast %328 : vector<16x32xf32> to vector<2x8x32xf32>
    %cst_151 = arith.constant dense<0xFF800000> : vector<2x32xf32>
    %330 = vector.multi_reduction <maximumf>, %329, %cst_151 [1] : vector<2x8x32xf32> to vector<2x32xf32>
    %c0_152 = arith.constant 0 : index
    %c0_153 = arith.constant 0 : index
    %331 = vector.load %arg18[%c0_152, %c0_153] : memref<32x3xf32, #tpu.memory_space<vmem>>, vector<32x3xf32>
    %cst_154 = arith.constant dense<0.000000e+00> : vector<2x3xf32>
    %332 = tpu.matmul %330, %331, %cst_154 {dimension_numbers = #tpu.dot_dimension_numbers<[1], [0], [0], [1], [0, 0, 1, 1], [], []>} : vector<2x32xf32>, vector<32x3xf32>, vector<2x3xf32> -> vector<2x3xf32>
    %c0_155 = arith.constant 0 : index
    %c0_156 = arith.constant 0 : index
    %333 = vector.load %arg19[%c0_155, %c0_156] : memref<1x3xf32, #tpu.memory_space<vmem>>, vector<1x3xf32>
    %334 = vector.broadcast %333 : vector<1x3xf32> to vector<2x3xf32>
    %335 = arith.addf %332, %334 : vector<2x3xf32>
    %cst_157 = arith.constant dense<0xFF800000> : vector<2xf32>
    %336 = vector.multi_reduction <maximumf>, %335, %cst_157 [1] : vector<2x3xf32> to vector<2xf32>
    %337 = vector.shape_cast %336 : vector<2xf32> to vector<2x1xf32>
    %338 = vector.broadcast %337 : vector<2x1xf32> to vector<2x3xf32>
    %339 = arith.subf %335, %338 : vector<2x3xf32>
    %340 = math.exp %339 : vector<2x3xf32>
    %cst_158 = arith.constant dense<0.000000e+00> : vector<2xf32>
    %341 = vector.multi_reduction <add>, %340, %cst_158 [1] : vector<2x3xf32> to vector<2xf32>
    %342 = vector.shape_cast %341 : vector<2xf32> to vector<2x1xf32>
    %343 = math.log %342 : vector<2x1xf32>
    %344 = arith.addf %337, %343 : vector<2x1xf32>
    %345 = vector.broadcast %344 : vector<2x1xf32> to vector<2x3xf32>
    %346 = arith.subf %335, %345 : vector<2x3xf32>
    %c0_159 = arith.constant 0 : index
    %c0_160 = arith.constant 0 : index
    %347 = vector.load %arg20[%c0_159, %c0_160] : memref<2x3xf32, #tpu.memory_space<vmem>>, vector<2x3xf32>
    tpu.vector_store %arg20[%c0_159, %c0_160], %346 {strides = array<i32>} : memref<2x3xf32, #tpu.memory_space<vmem>>, vector<2x3xf32>,
    return
  }
}

</mosaic_0001>

<bundles_post_ra>
// kernel: hate_speech_forward.1
= control target key start
LH: loop header
LB: loop body
LE: loop exit
PB: predicated region body
PF: predicated region fallthrough
CT: control target
= control target key end

     0   :  { %s4105_s0 = inlined_call_operand.vmem [shape: s32[16,1], index: 0, kind: input, shape index: {}]   ;;  %s4106_s1 = inlined_call_operand.vmem [shape: f32[2,8], index: 1, kind: input, shape index: {}]   ;;  %s4107_s2 = inlined_call_operand.vmem [shape: f32[100,32], index: 2, kind: input, shape index: {}]   ;;  %s4108_s3 = inlined_call_operand.vmem [shape: f32[8,32], index: 3, kind: input, shape index: {}]   ;;  %s4109_s4 = inlined_call_operand.vmem [shape: f32[1,32], index: 4, kind: input, shape index: {}]   ;;  %s4110_s5 = inlined_call_operand.vmem [shape: f32[1,32], index: 5, kind: input, shape index: {}]   ;;  %s4111_s6 = inlined_call_operand.vmem [shape: f32[2,32,96], index: 6, kind: input, shape index: {}]   ;;  %s4112_s7 = inlined_call_operand.vmem [shape: f32[2,1,96], index: 7, kind: input, shape index: {}]   ;;  %s4113_s8 = inlined_call_operand.vmem [shape: f32[2,2,16,32], index: 8, kind: input, shape index: {}]   ;;  %s4114_s9 = inlined_call_operand.vmem [shape: f32[2,1,32], index: 9, kind: input, shape index: {}]   ;;  %s4115_s10 = inlined_call_operand.vmem [shape: f32[2,1,32], index: 10, kind: input, shape index: {}]   ;;  %s4116_s11 = inlined_call_operand.vmem [shape: f32[2,1,32], index: 11, kind: input, shape index: {}]   ;;  %s4117_s12 = inlined_call_operand.vmem [shape: f32[2,32,64], index: 12, kind: input, shape index: {}]   ;;  %s4118_s13 = inlined_call_operand.vmem [shape: f32[2,1,64], index: 13, kind: input, shape index: {}]   ;;  %s4119_s14 = inlined_call_operand.vmem [shape: f32[2,64,32], index: 14, kind: input, shape index: {}]   ;;  %s4120_s15 = inlined_call_operand.vmem [shape: f32[2,1,32], index: 15, kind: input, shape index: {}]   ;;  %s4121_s16 = inlined_call_operand.vmem [shape: f32[2,1,32], index: 16, kind: input, shape index: {}]   ;;  %s4122_s17 = inlined_call_operand.vmem [shape: f32[2,1,32], index: 17, kind: input, shape index: {}]   ;;  %s4123_s18 = inlined_call_operand.vmem [shape: f32[32,3], index: 18, kind: input, shape index: {}]   ;;  %s4124_s19 = inlined_call_operand.vmem [shape: f32[1,3], index: 19, kind: input, shape index: {}]   ;;  %s4125_s20 = inlined_call_operand.hbm [shape: f32[2,3], index: 20, kind: output, shape index: {}]  }
   0x1   :  { %4129 = sst [smem:[#allocation5_spill]] %s4105_s0 }
   0x2   :  { %4130 = sst [smem:[#allocation6_spill]] %s4106_s1 }
   0x3   :  { %4131 = sst [smem:[#allocation7_spill]] %s4107_s2 }
   0x4   :  { %4132 = sst [smem:[#allocation8_spill]] %s4108_s3 }
   0x5   :  { %4133 = sst [smem:[#allocation9_spill]] %s4109_s4 }
   0x6   :  { %4134 = sst [smem:[#allocation10_spill]] %s4120_s15 }
   0x7   :  { %s4135_s23 = sld [smem:[#allocation5_spill]]  ;;  %s4136_s15 = sld [smem:[#allocation7_spill]]  ;;  %v3521_v2 = vmov 0  }
   0x8   :  { %3432 = vset.pattern.permute.xlu0 %v3521_v2 }
   0xd   :  { %v66_v0 = vld [vmem:[%s4135_s23] sm:$0xff]  ;;  %v84_v3 = vld [vmem:[%s4136_s15 + $0x8] sm:$0xff]  ;;  %v85_v4 = vld [vmem:[%s4136_s15 + $0x10] sm:$0xff] }
   0xe   :  { %v83_v1 = vld [vmem:[%s4136_s15] sm:$0xff]  ;;  %v86_v5 = vld [vmem:[%s4136_s15 + $0x18] sm:$0xff]  ;;  %71 = vperm.xlu0 %3432, %v66_v0   ;;  %v67_v8 = vld [vmem:[%s4135_s23 + $0x8] sm:$0xff] }
   0xf   :  { %v3307_v6 = vpack.c.bf16 %v84_v3, %v83_v1  ;;  %v3311_v7 = vpack.c.bf16 %v86_v5, %v85_v4  ;;  %v87_v9 = vld [vmem:[%s4136_s15 + $0x20] sm:$0xff]  ;;  %v88_v10 = vld [vmem:[%s4136_s15 + $0x28] sm:$0xff] }
  0x11   :  { %3308 = vmatprep.subr.bf16.mxu0 %v3307_v6 }
  0x12   :  { %25 = vsyncpa [#allocation3], 0  ;;  %3310 = vmatpush3.bf16.msra.mxu0 %v3307_v6  ;;  %74 = vperm.xlu0 %3432, %v67_v8   ;;  %v3315_v11 = vpack.c.bf16 %v88_v10, %v87_v9  ;;  %v89_v12 = vld [vmem:[%s4136_s15 + $0x30] sm:$0xff]  ;;  %v90_v13 = vld [vmem:[%s4136_s15 + $0x38] sm:$0xff]  ;;  %vm103_vm0 = vcmask 1043456   ;;  %v3522_v22 = vmov 0.0   ;;  %v68_v23 = vlaneseq }
  0x13   :  { %3312 = vmatprep.subr.bf16.mxu0 %v3311_v7  ;;  %v3319_v14 = vpack.c.bf16 %v90_v13, %v89_v12  ;;  %v91_v15 = vld [vmem:[%s4136_s15 + $0x40] sm:$0xff]  ;;  %v92_v16 = vld [vmem:[%s4136_s15 + $0x48] sm:$0xff]  ;;  %v93_v18 = vld [vmem:[%s4136_s15 + $0x50] sm:$0xff]  ;;  %vm96_vm1 = vcmask 818176   ;;  %s4137_s24 = sld [smem:[#allocation8_spill]]  ;;  %vm184_vm4 = vcmask 261120  }
  0x14   :  { %v3323_v17 = vpack.c.bf16 %v92_v16, %v91_v15  ;;  %v94_v19 = vld [vmem:[%s4136_s15 + $0x58] sm:$0xff]  ;;  %v95_v21 = vld [vmem:[%s4136_s15 + $0x60] sm:$0xf]  ;;  %v69_v24 = vand.u32 127, %v68_v23  ;;  %v258_v47 = vld [vmem:[%s4111_s6 + $0x8] sm:$0xff]  ;;  %s4138_s0 = sld [smem:[#allocation9_spill]] }
  0x15   :  { %v3327_v20 = vpack.c.bf16 %v94_v19, %v93_v18  ;;  %v257_v46 = vld [vmem:[%s4111_s6] sm:$0xff]  ;;  %v259_v48 = vld [vmem:[%s4111_s6 + $0x10] sm:$0xff]  ;;  %v260_v50 = vld [vmem:[%s4111_s6 + $0x18] sm:$0xff]  ;;  %vm3523_vm5 = vmmov 0   ;;  %s3524_s22 = smov 96   ;;  %vm370_vm6 = vcmask 130048  }
  0x16   :  { %3314 = vmatpush3.bf16.msra.mxu0 %v3311_v7  ;;  %v3331_v49 = vpack.c.bf16 %v258_v47, %v257_v46  ;;  %v3335_v51 = vpack.c.bf16 %v260_v50, %v259_v48  ;;  %v2874_v61 = vld [vmem:[%s4110_s5] ss:$0 sm:$0xff]  ;;  %v3525_v13 = vmov 1966171168   ;;  %v235_v16 = vshrl.u32 %v68_v23, 7  ;;  %s4139_s25 = sld [smem:[#allocation6_spill]] }
  0x17   :  { %3316 = vmatprep.subr.bf16.mxu0 %v3315_v11  ;;  %v2875_v4 = vld [vmem:[%s4112_s7] ss:$0 sm:$0xff]  ;;  %vm524_vm7 = vcmask 64512   ;;  %s3526_s23 = smov 64   ;;  %s3527_s3 = smov 80   ;;  %vm1371_vm8 = vcmask 523264  }
  0x18   :  { %3332 = vmatprep.subr.bf16.mxu1 %v3331_v49  ;;  %s3528_s26 = smov 112   ;;  %s3529_s27 = smov 48   ;;  %vm2765_vm9 = vcmask 1041409   ;;  %vm2839_vm10 = vcmask 17408  }
  0x19   :  { %v82_v29 = vld [vmem:[%s4137_s24] sm:$0xff]  ;;  %3334 = vmatpush3.bf16.msra.mxu1 %v3331_v49  ;;  %s4140_s1 = sld [smem:[#allocation10_spill]] }
  0x1a   :  { %3318 = vmatpush3.bf16.msra.mxu0 %v3315_v11  ;;  %3336 = vmatprep.subr.bf16.mxu1 %v3335_v51  ;;  %v2873_v59 = vld [vmem:[%s4138_s0] ss:$0 sm:$0xff] }
  0x1b   :  { %3320 = vmatprep.subr.bf16.mxu0 %v3319_v14 }
  0x1d   :  { %3338 = vmatpush3.bf16.msra.mxu1 %v3335_v51 }
  0x1e   :  { %3322 = vmatpush3.bf16.msra.mxu0 %v3319_v14  ;;  %3122 = vmatprep.subr.mxu1 %v3522_v22  ;;  %v232_v14 = vunpack.c.l.s4 %v3525_v13 }
  0x1f   :  { %3324 = vmatprep.subr.bf16.mxu0 %v3323_v17 }
  0x20   :  { %v233_v15 = vunpack.c.0.s8 %v232_v14 }
  0x22   :  { %3326 = vmatpush3.bf16.msra.mxu0 %v3323_v17  ;;  %v228_v17 = vld [vmem:[%s4139_s25] sm:$0x3]  ;;  %v236_v18 = vsub.s32 %v233_v15, %v235_v16 }
  0x23   :  { %3328 = vmatprep.subr.bf16.mxu0 %v3327_v20  ;;  %v229_v19 = vsub.f32 1.0, %v228_v17 }
  0x26   :  { %3330 = vmatpush3.bf16.msra.mxu0 %v3327_v20  ;;  %v237_v20 = vrot.slane %v229_v19, %v236_v18 }
  0x27   :  { %3101 = vmatprep.subr.msk.mxu0 %vm103_vm0, %v95_v21 }
  0x2a   :  { %3102 = vmatpush3.msk.msra.mxu0 %vm103_vm0, %v95_v21  ;;  %v245_v21 = vrot.slane %v237_v20, %v236_v18 }
  0x2b   :  { %3117 = vmatprep.subr.mxu0 %v3522_v22 }
  0x8d   :  { %v72_v25 = vpop.permute.xlu0 %71 }
  0x8e   :  { %vm76_vm2 = vcmp.eq.s32.totalorder %v72_v25, %v69_v24  ;;  %v359_v25 = vsub.s32 0, %v235_v16 }
  0x8f   :  { %v2868_v26 = vsel %vm76_vm2, 1.0, %v3522_v22 }
  0x90   :  { %3103 = vmatprep.mubr.msk.f32.mxu0 %vm96_vm1, %v2868_v26  ;;  %v255_v26 = vmul.f32 -1e+09, %v245_v21 }
  0x91   :  { %v75_v27 = vpop.permute.xlu0 %74 }
  0x92   :  { %vm77_vm3 = vcmp.eq.s32.totalorder %v75_v27, %v69_v24  ;;  %v238_v24 = vcombine.high %v237_v20, %v237_v20 }
  0x93   :  { %v2869_v28 = vsel %vm77_vm3, 1.0, %v3522_v22 }
  0x94   :  { %3104 = vmatmul.mubr.msk.f32.vlgmr.msra.gmra.mrb[0].mxu0 %vm96_vm1, %v2869_v28  ;;  %v252_v27 = vrot.slane %v238_v24, %v236_v18  ;;  %v3751_v28 = vrot.slane %v255_v26, %v359_v25 }
  0x95   :  { %3119 = vmatprep.mubr.msk.f32.mxu0 %vm3523_vm5, %v3522_v22 }
 0x167   :  { %v3105_v30 = vpop.f32.mrb[0].mxu0 }
 0x168   :  { %v173_v31 = vpop.f32.mrb[1].mxu0  ;;  %v179_v33 = vadd.f32 %v3105_v30, %v82_v29 }
 0x169   :  { %v174_v32 = vadd.f32 %v173_v31, %v82_v29  ;;  %v256_v29 = vmul.f32 -1e+09, %v252_v27 }
 0x16a   :  { %v188_v35 = vsel %vm184_vm4, %v179_v33, 0.0 }
 0x16b   :  { %v185_v34 = vsel %vm184_vm4, %v174_v32, 0.0 }
 0x16c   :  { %186 = vadd.xlane.f32.xlu1 %v185_v34 }
 0x170   :  { %189 = vadd.xlane.f32.xlu1 %v188_v35 }
 0x1f9   :  { %v187_v36 = vpop.xlane.xlu1 %186 }
 0x1fa   :  { %v192_v37 = vmul.f32 0.03125, %v187_v36 }
 0x1fc   :  { %v194_v38 = vsub.f32 %v174_v32, %v192_v37  ;;  %v3754_v32 = vrot.slane %v256_v29, %v359_v25 }
 0x1fd   :  { %v190_v39 = vpop.xlane.xlu1 %189 }
 0x1fe   :  { %v193_v40 = vmul.f32 0.03125, %v190_v39  ;;  %v196_v41 = vmul.f32 %v194_v38, %v194_v38 }
 0x200   :  { %v195_v42 = vsub.f32 %v179_v33, %v193_v40  ;;  %v198_v43 = vsel %vm184_vm4, %v196_v41, 0.0 }
 0x201   :  { %199 = vadd.xlane.f32.xlu0 %v198_v43 }
 0x202   :  { %v197_v44 = vmul.f32 %v195_v42, %v195_v42 }
 0x204   :  { %v201_v45 = vsel %vm184_vm4, %v197_v44, 0.0 }
 0x205   :  { %202 = vadd.xlane.f32.xlu1 %v201_v45 }
 0x28e   :  { %v200_v52 = vpop.xlane.xlu0 %199 }
 0x28f   :  { %v204_v53 = vmul.f32 0.03125, %v200_v52 }
 0x291   :  { %v206_v54 = vadd.f32 1e-12, %v204_v53 }
 0x292   :  { %v203_v55 = vpop.xlane.xlu1 %202 }
 0x293   :  { %3433 = vrsqrt.f32 %v206_v54  ;;  %v205_v56 = vmul.f32 0.03125, %v203_v55 }
 0x295   :  { %v207_v57 = vadd.f32 1e-12, %v205_v56 }
 0x297   :  { %3435 = vrsqrt.f32 %v207_v57 }
 0x29d   :  { %v3434_v58 = vpop.eup %3433 }
 0x29e   :  { %v210_v60 = vmul.f32 %v3434_v58, %v194_v38 }
 0x2a0   :  { %v218_v62 = vmul.f32 %v2873_v59, %v210_v60 }
 0x2a1   :  { %v3436_v63 = vpop.eup %3435 }
 0x2a2   :  { %v211_v0 = vmul.f32 %v3436_v63, %v195_v42  ;;  %v3712_v1 = vadd.f32 %v2874_v61, %v218_v62 }
 0x2a4   :  { %v219_v2 = vmul.f32 %v2873_v59, %v211_v0  ;;  %3114 = vmatprep.mubr.msk.f32.mxu1 %vm184_vm4, %v3712_v1 }
 0x2a6   :  { %v3716_v3 = vadd.f32 %v2874_v61, %v219_v2 }
 0x2a8   :  { %3115 = vmatmul.mubr.msk.f32.vlgmr.msra.gmra.mrb[0].mxu1 %vm184_vm4, %v3716_v3 }
 0x2a9   :  { %3124 = vmatprep.mubr.msk.f32.mxu1 %vm3523_vm5, %v3522_v22 }
 0x37b   :  { %v3116_v5 = vpop.f32.mrb[0].mxu1 }
 0x37c   :  { %v340_v6 = vpop.f32.mrb[1].mxu1  ;;  %v3731_v8 = vadd.f32 %v3116_v5, %v2875_v4 }
 0x37d   :  { %v3727_v7 = vadd.f32 %v2875_v4, %v340_v6 }
 0x37e   :  { %v354_v12 = vmul.f32 0.25, %v3731_v8 }
 0x37f   :  { %368 = vrot.lane.b32.xlu1 %v3727_v7, %s3524_s22  ;;  %v353_v10 = vmul.f32 0.25, %v3727_v7 }
 0x383   :  { %447 = vrot.lane.b32.xlu1 %v3731_v8, %s3524_s22 }
 0x3f1   :  { %v369_v9 = vpop.permute.xlu1 %368 }
 0x3f2   :  { %3118 = vmatpush3.xpose.msk.msra.mxu0 %vm370_vm6, %v369_v9 }
 0x3f3   :  { %3142 = vmatprep.subr.mxu0 %v3522_v22 }
 0x3f5   :  { %v448_v11 = vpop.permute.xlu1 %447  ;;  %3120 = vmatmul.mubr.msk.f32.vlgmr.msra.gmra.mrb[2].mxu0 %vm370_vm6, %v353_v10 }
 0x3f6   :  { %3123 = vmatpush3.xpose.msk.msra.mxu1 %vm370_vm6, %v448_v11  ;;  %3144 = vmatprep.mubr.msk.f32.mxu0 %vm3523_vm5, %v3522_v22 }
 0x3f7   :  { %3127 = vmatprep.subr.mxu1 %v3522_v22 }
 0x3f9   :  { %3125 = vmatmul.mubr.msk.f32.vlgmr.msra.gmra.mrb[2].mxu1 %vm370_vm6, %v354_v12 }
 0x3fa   :  { %3129 = vmatprep.mubr.msk.f32.mxu1 %vm3523_vm5, %v3522_v22 }
 0x4c8   :  { %v442_v30 = vpop.f32.mrb[2].mxu0 }
 0x4c9   :  { %v443_v31 = vadd.f32 %v442_v30, %v3751_v28  ;;  %v3121_v23 = vpop.f32.mrb[3].mxu0 }
 0x4cb   :  { %v525_v33 = vsel %vm524_vm7, %v443_v31, -inf }
 0x4cc   :  { %v520_v34 = vpop.f32.mrb[2].mxu1  ;;  %526 = vmax.xlane.f32.xlu1 %v525_v33 }
 0x4cd   :  { %v521_v35 = vadd.f32 %v520_v34, %v3754_v32  ;;  %v3126_v36 = vpop.f32.mrb[3].mxu1  ;;  %v349_v34 = vld [vmem:[%s4113_s8] sm:$0xff] }
 0x4cf   :  { %v528_v37 = vsel %vm524_vm7, %v521_v35, -inf }
 0x4d0   :  { %529 = vmax.xlane.f32.xlu0 %v528_v37 }
 0x4dd   :  { %623 = vrot.lane.b32.xlu1 %v3731_v8, %s3526_s23 }
 0x4e6   :  { %547 = vrot.lane.b32.xlu0 %v3727_v7, %s3526_s23 }
 0x4ea   :  { %701 = vrot.lane.b32.xlu0 %v3727_v7, %s3527_s3 }
 0x559   :  { %v527_v38 = vpop.xlane.xlu1 %526 }
 0x55a   :  { %v531_v39 = vsub.f32 %v443_v31, %v527_v38 }
 0x55c   :  { %v533_v42 = vmul.f32 1.442695, %v531_v39 }
 0x55d   :  { %v530_v40 = vpop.xlane.xlu0 %529  ;;  %v624_v58 = vpop.permute.xlu1 %623 }
 0x55e   :  { %v532_v41 = vsub.f32 %v521_v35, %v530_v40  ;;  %v350_v35 = vld [vmem:[%s4113_s8 + $0x8] sm:$0xff] }
 0x55f   :  { %v3343_v36 = vpack.c.bf16 %v350_v35, %v349_v34 }
 0x560   :  { %v535_v43 = vmul.f32 1.442695, %v532_v41  ;;  %v2894_v41 = vld [vmem:[%s4114_s9] ss:$0 sm:$0xff] }
 0x561   :  { %v548_v44 = vpop.permute.xlu0 %547 }
 0x562   :  { %3437 = vpow2.f32 %v535_v43  ;;  %3128 = vmatpush3.msra.mxu1 %v548_v44 }
 0x563   :  { %3132 = vmatprep.subr.mxu1 %v3522_v22  ;;  %3439 = vpow2.f32 %v533_v42 }
 0x565   :  { %v702_v49 = vpop.permute.xlu0 %701 }
 0x56c   :  { %v3438_v45 = vpop.eup %3437 }
 0x56d   :  { %v540_v46 = vsel %vm524_vm7, %v3438_v45, 0.0  ;;  %v3440_v47 = vpop.eup %3439 }
 0x56e   :  { %541 = vadd.xlane.f32.xlu0 %v540_v46  ;;  %v537_v48 = vsel %vm524_vm7, %v3440_v47, 0.0 }
 0x572   :  { %538 = vadd.xlane.f32.xlu0 %v537_v48 }
 0x588   :  { %779 = vrot.lane.b32.xlu0 %v3731_v8, %s3527_s3 }
 0x58c   :  { %699 = vrot.lane.b32.xlu0 %v353_v10, %s3528_s26 }
 0x590   :  { %777 = vrot.lane.b32.xlu0 %v354_v12, %s3528_s26 }
 0x5fb   :  { %v542_v50 = vpop.xlane.xlu0 %541 }
 0x5ff   :  { %v539_v51 = vpop.xlane.xlu0 %538 }
 0x600   :  { %3441 = vrcp.f32 %v539_v51 }
 0x601   :  { %3443 = vrcp.f32 %v542_v50 }
 0x603   :  { %v780_v52 = vpop.permute.xlu0 %779 }
 0x604   :  { %3143 = vmatpush3.xpose.msk.msra.mxu0 %vm370_vm6, %v780_v52 }
 0x605   :  { %3152 = vmatprep.subr.mxu0 %v3522_v22 }
 0x607   :  { %v700_v53 = vpop.permute.xlu0 %699 }
 0x60a   :  { %v3442_v54 = vpop.eup %3441 }
 0x60b   :  { %v545_v55 = vmul.f32 %v3442_v54, %v3440_v47  ;;  %v778_v56 = vpop.permute.xlu0 %777  ;;  %v3444_v57 = vpop.eup %3443 }
 0x60c   :  { %3145 = vmatmul.mubr.msk.f32.vlgmr.msra.gmra.mrb[4].mxu0 %vm370_vm6, %v778_v56  ;;  %v546_v59 = vmul.f32 %v3444_v57, %v3438_v45 }
 0x60d   :  { %3130 = vmatmul.mubr.msk.f32.vlgmr.msra.gmra.mrb[4].mxu1 %vm524_vm7, %v545_v55  ;;  %3154 = vmatprep.mubr.msk.f32.mxu0 %vm3523_vm5, %v3522_v22 }
 0x60e   :  { %3133 = vmatpush3.msra.mxu1 %v624_v58  ;;  %3134 = vmatprep.mubr.msk.f32.mxu1 %vm3523_vm5, %v3522_v22 }
 0x60f   :  { %3137 = vmatprep.subr.mxu1 %v3522_v22 }
 0x611   :  { %3135 = vmatmul.mubr.msk.f32.vlgmr.msra.gmra.mrb[6].mxu1 %vm524_vm7, %v546_v59  ;;  %v1247_v59 = vld [vmem:[%s4117_s12 + $0x8] sm:$0xff] }
 0x612   :  { %3139 = vmatprep.mubr.msk.f32.mxu1 %vm3523_vm5, %v3522_v22 }
 0x615   :  { %3138 = vmatpush3.xpose.msk.msra.mxu1 %vm370_vm6, %v702_v49 }
 0x616   :  { %3147 = vmatprep.subr.mxu1 %v3522_v22 }
 0x618   :  { %3140 = vmatmul.mubr.msk.f32.vlgmr.msra.gmra.mrb[8].mxu1 %vm370_vm6, %v700_v53 }
 0x619   :  { %3149 = vmatprep.mubr.msk.f32.mxu1 %vm3523_vm5, %v3522_v22 }
 0x6df   :  { %v851_v60 = vpop.f32.mrb[4].mxu0 }
 0x6e0   :  { %v852_v61 = vadd.f32 %v851_v60, %v3754_v32  ;;  %v619_v62 = vpop.f32.mrb[4].mxu1  ;;  %v3146_v63 = vpop.f32.mrb[5].mxu0 }
 0x6e1   :  { %v3131_v0 = vpop.f32.mrb[5].mxu1 }
 0x6e2   :  { %v858_v2 = vsel %vm524_vm7, %v852_v61, -inf }
 0x6e3   :  { %859 = vmax.xlane.f32.xlu0 %v858_v2 }
 0x6e4   :  { %v695_v4 = vpop.f32.mrb[6].mxu1 }
 0x6e5   :  { %v3136_v5 = vpop.f32.mrb[7].mxu1 }
 0x6eb   :  { %v773_v6 = vpop.f32.mrb[8].mxu1 }
 0x6ec   :  { %v774_v9 = vadd.f32 %v773_v6, %v3751_v28  ;;  %v3141_v10 = vpop.f32.mrb[9].mxu1 }
 0x6ee   :  { %v855_v11 = vsel %vm524_vm7, %v774_v9, -inf }
 0x6ef   :  { %856 = vmax.xlane.f32.xlu1 %v855_v11  ;;  %v2895_v11 = vld [vmem:[%s4115_s10] ss:$0 sm:$0xff] }
 0x770   :  { %v860_v12 = vpop.xlane.xlu0 %859 }
 0x771   :  { %v862_v13 = vsub.f32 %v852_v61, %v860_v12  ;;  %v1248_v61 = vld [vmem:[%s4117_s12 + $0x10] sm:$0xff] }
 0x773   :  { %v865_v14 = vmul.f32 1.442695, %v862_v13 }
 0x775   :  { %3445 = vpow2.f32 %v865_v14 }
 0x77c   :  { %v857_v15 = vpop.xlane.xlu1 %856 }
 0x77d   :  { %v861_v16 = vsub.f32 %v774_v9, %v857_v15  ;;  %v2896_v15 = vld [vmem:[%s4116_s11] ss:$0 sm:$0xff] }
 0x77f   :  { %v3446_v17 = vpop.eup %3445  ;;  %v863_v18 = vmul.f32 1.442695, %v861_v16 }
 0x780   :  { %v870_v19 = vsel %vm524_vm7, %v3446_v17, 0.0 }
 0x781   :  { %3447 = vpow2.f32 %v863_v18  ;;  %871 = vadd.xlane.f32.xlu1 %v870_v19 }
 0x78b   :  { %v3448_v20 = vpop.eup %3447 }
 0x78c   :  { %v867_v21 = vsel %vm524_vm7, %v3448_v20, 0.0 }
 0x78d   :  { %868 = vadd.xlane.f32.xlu0 %v867_v21  ;;  %v1357_v21 = vld [vmem:[%s4119_s14 + $0x8] sm:$0xff] }
 0x792   :  { %953 = vrot.lane.b32.xlu1 %v3731_v8, %s3529_s27  ;;  %v352_v8 = vld [vmem:[%s4113_s8 + $0x18] sm:$0xff] }
 0x7a3   :  { %877 = vrot.lane.b32.xlu0 %v3727_v7, %s3529_s27  ;;  %v351_v7 = vld [vmem:[%s4113_s8 + $0x10] sm:$0xff] }
 0x7a4   :  { %v3339_v33 = vpack.c.bf16 %v352_v8, %v351_v7  ;;  %v1363_v7 = vld [vmem:[%s4119_s14 + $0x38] sm:$0xff] }
 0x80e   :  { %v872_v24 = vpop.xlane.xlu1 %871 }
 0x80f   :  { %3449 = vrcp.f32 %v872_v24 }
 0x812   :  { %v954_v25 = vpop.permute.xlu1 %953 }
 0x813   :  { %3153 = vmatpush3.msra.mxu0 %v954_v25  ;;  %v1358_v25 = vld [vmem:[%s4119_s14 + $0x10] sm:$0xff] }
 0x819   :  { %v3450_v26 = vpop.eup %3449 }
 0x81a   :  { %v876_v27 = vmul.f32 %v3450_v26, %v3446_v17  ;;  %v869_v29 = vpop.xlane.xlu0 %868  ;;  %v1359_v26 = vld [vmem:[%s4119_s14 + $0x18] sm:$0xff] }
 0x81b   :  { %3451 = vrcp.f32 %v869_v29  ;;  %v3359_v29 = vpack.c.bf16 %v1359_v26, %v1358_v25 }
 0x81c   :  { %3155 = vmatmul.mubr.msk.f32.vlgmr.msra.gmra.mrb[6].mxu0 %vm524_vm7, %v876_v27  ;;  %v1360_v27 = vld [vmem:[%s4119_s14 + $0x20] sm:$0xff] }
 0x81e   :  { %v878_v30 = vpop.permute.xlu0 %877 }
 0x81f   :  { %3148 = vmatpush3.msra.mxu1 %v878_v30  ;;  %v1361_v30 = vld [vmem:[%s4119_s14 + $0x28] sm:$0xff] }
 0x820   :  { %3340 = vmatprep.subr.bf16.mxu1 %v3339_v33 }
 0x825   :  { %v3452_v31 = vpop.eup %3451 }
 0x826   :  { %v875_v23 = vmul.f32 %v3452_v31, %v3448_v20  ;;  %v1356_v20 = vld [vmem:[%s4119_s14] sm:$0xff]  ;;  %v3363_v31 = vpack.c.bf16 %v1361_v30, %v1360_v27 }
 0x827   :  { %v3355_v24 = vpack.c.bf16 %v1357_v21, %v1356_v20 }
 0x828   :  { %3150 = vmatmul.mubr.msk.f32.vlgmr.msra.gmra.mrb[10].mxu1 %vm524_vm7, %v875_v23  ;;  %v1362_v23 = vld [vmem:[%s4119_s14 + $0x30] sm:$0xff] }
 0x829   :  { %3342 = vmatpush3.bf16.msra.mxu1 %v3339_v33  ;;  %v3367_v8 = vpack.c.bf16 %v1363_v7, %v1362_v23  ;;  %v2897_v33 = vld [vmem:[%s4118_s13] ss:$0 sm:$0xff] }
 0x82a   :  { %3344 = vmatprep.subr.bf16.mxu1 %v3343_v36  ;;  %v2904_v7 = vld [vmem:[%s4122_s17] ss:$0 sm:$0xff] }
 0x8ef   :  { %v1025_v37 = vpop.f32.mrb[6].mxu0 }
 0x8f0   :  { %v3156_v38 = vpop.f32.mrb[7].mxu0 }
 0x8fb   :  { %v949_v39 = vpop.f32.mrb[10].mxu1 }
 0x8fc   :  { %v3151_v40 = vpop.f32.mrb[11].mxu1  ;;  %3161 = vmatprep.mubr.msk.f32.mxu1 %vm370_vm6, %v949_v39 }
 0x8fd   :  { %3162 = vmatmul.mubr.msk.f32.vlgmr.msra.gmra.mrb[12].mxu1 %vm370_vm6, %v1025_v37 }
 0x8fe   :  { %3346 = vmatpush3.bf16.msra.mxu1 %v3343_v36  ;;  %3168 = vmatprep.mubr.msk.f32.mxu1 %vm370_vm6, %v619_v62  ;;  %v1249_v62 = vld [vmem:[%s4117_s12 + $0x18] sm:$0xff] }
 0x8ff   :  { %v3351_v63 = vpack.c.bf16 %v1249_v62, %v1248_v61  ;;  %3356 = vmatprep.subr.bf16.mxu1 %v3355_v24 }
 0x905   :  { %3169 = vmatmul.mubr.msk.f32.vlgmr.msra.gmra.mrb[12].mxu1 %vm370_vm6, %v695_v4 }
 0x906   :  { %3358 = vmatpush3.bf16.msra.mxu1 %v3355_v24 }
 0x907   :  { %3360 = vmatprep.subr.bf16.mxu1 %v3359_v29 }
 0x90a   :  { %3362 = vmatpush3.bf16.msra.mxu1 %v3359_v29  ;;  %v2903_v29 = vld [vmem:[%s4121_s16] ss:$0 sm:$0xff] }
 0x90b   :  { %3364 = vmatprep.subr.bf16.mxu1 %v3363_v31 }
 0x90e   :  { %3366 = vmatpush3.bf16.msra.mxu1 %v3363_v31 }
 0x90f   :  { %3368 = vmatprep.subr.bf16.mxu1 %v3367_v8 }
 0x912   :  { %3370 = vmatpush3.bf16.msra.mxu1 %v3367_v8 }
 0x913   :  { %3222 = vmatprep.subr.mxu1 %v3522_v22 }
 0x9d8   :  { %v3170_v42 = vpop.f32.mrb[12].mxu1 }
 0x9d9   :  { %v1199_v43 = vadd.f32 %v3170_v42, %v2894_v41  ;;  %v1182_v44 = vpop.f32.mrb[13].mxu1 }
 0x9da   :  { %v1198_v45 = vadd.f32 %v2894_v41, %v1182_v44 }
 0x9db   :  { %v1201_v46 = vadd.f32 %v1199_v43, %v3716_v3 }
 0x9dc   :  { %v1200_v47 = vadd.f32 %v1198_v45, %v3712_v1  ;;  %v1246_v1 = vld [vmem:[%s4117_s12] sm:$0xff] }
 0x9dd   :  { %v1207_v48 = vsel %vm184_vm4, %v1201_v46, 0.0  ;;  %v3347_v60 = vpack.c.bf16 %v1247_v59, %v1246_v1 }
 0x9de   :  { %1208 = vadd.xlane.f32.xlu0 %v1207_v48  ;;  %v1204_v49 = vsel %vm184_vm4, %v1200_v47, 0.0 }
 0x9df   :  { %1205 = vadd.xlane.f32.xlu1 %v1204_v49  ;;  %3348 = vmatprep.subr.bf16.mxu0 %v3347_v60 }
 0x9e0   :  { %3350 = vmatpush3.bf16.msra.mxu0 %v3347_v60 }
 0x9e1   :  { %3352 = vmatprep.subr.bf16.mxu0 %v3351_v63 }
 0x9e4   :  { %3354 = vmatpush3.bf16.msra.mxu0 %v3351_v63 }
 0xa6b   :  { %v1209_v50 = vpop.xlane.xlu0 %1208 }
 0xa6c   :  { %v1211_v51 = vmul.f32 0.03125, %v1209_v50  ;;  %v1206_v52 = vpop.xlane.xlu1 %1205 }
 0xa6d   :  { %v1210_v53 = vmul.f32 0.03125, %v1206_v52 }
 0xa6e   :  { %v1213_v54 = vsub.f32 %v1201_v46, %v1211_v51 }
 0xa6f   :  { %v1212_v55 = vsub.f32 %v1200_v47, %v1210_v53 }
 0xa70   :  { %v1215_v56 = vmul.f32 %v1213_v54, %v1213_v54 }
 0xa71   :  { %v1214_v57 = vmul.f32 %v1212_v55, %v1212_v55 }
 0xa72   :  { %v1219_v58 = vsel %vm184_vm4, %v1215_v56, 0.0  ;;  %v2900_v56 = vld [vmem:[%s4140_s1] ss:$0 sm:$0xff] }
 0xa73   :  { %1220 = vadd.xlane.f32.xlu1 %v1219_v58  ;;  %v1216_v3 = vsel %vm184_vm4, %v1214_v57, 0.0 }
 0xa74   :  { %1217 = vadd.xlane.f32.xlu0 %v1216_v3 }
 0xb00   :  { %v1221_v0 = vpop.xlane.xlu1 %1220 }
 0xb01   :  { %v1223_v2 = vmul.f32 0.03125, %v1221_v0  ;;  %v1218_v4 = vpop.xlane.xlu0 %1217 }
 0xb02   :  { %v1222_v5 = vmul.f32 0.03125, %v1218_v4 }
 0xb03   :  { %v1225_v6 = vadd.f32 1e-12, %v1223_v2 }
 0xb04   :  { %v1224_v9 = vadd.f32 1e-12, %v1222_v5 }
 0xb05   :  { %3453 = vrsqrt.f32 %v1225_v6 }
 0xb06   :  { %3455 = vrsqrt.f32 %v1224_v9 }
 0xb0f   :  { %v3454_v10 = vpop.eup %3453 }
 0xb10   :  { %v3456_v12 = vpop.eup %3455  ;;  %v1229_v13 = vmul.f32 %v3454_v10, %v1213_v54 }
 0xb11   :  { %v1228_v14 = vmul.f32 %v3456_v12, %v1212_v55 }
 0xb12   :  { %v1237_v16 = vmul.f32 %v2895_v11, %v1229_v13  ;;  %v2905_v13 = vld [vmem:[%s4111_s6 + $0x20] sm:$0xff] }
 0xb13   :  { %v1236_v17 = vmul.f32 %v2895_v11, %v1228_v14  ;;  %v2906_v14 = vld [vmem:[%s4111_s6 + $0x28] sm:$0xff] }
 0xb14   :  { %v1245_v19 = vadd.f32 %v2896_v15, %v1237_v16  ;;  %v2907_v16 = vld [vmem:[%s4111_s6 + $0x30] sm:$0xff] }
 0xb15   :  { %v1244_v18 = vadd.f32 %v2896_v15, %v1236_v17  ;;  %v3371_v15 = vpack.c.bf16 %v2906_v14, %v2905_v13  ;;  %v2908_v17 = vld [vmem:[%s4111_s6 + $0x38] sm:$0xff] }
 0xb17   :  { %3179 = vmatprep.mubr.msk.f32.mxu0 %vm184_vm4, %v1244_v18  ;;  %3372 = vmatprep.subr.bf16.mxu0 %v3371_v15 }
 0xb18   :  { %3180 = vmatmul.mubr.msk.f32.vlgmr.msra.gmra.mrb[8].mxu0 %vm184_vm4, %v1245_v19 }
 0xb19   :  { %3374 = vmatpush3.bf16.msra.mxu0 %v3371_v15 }
 0xbeb   :  { %v3181_v34 = vpop.f32.mrb[8].mxu0 }
 0xbec   :  { %v1335_v35 = vadd.f32 %v3181_v34, %v2897_v33  ;;  %v1329_v36 = vpop.f32.mrb[9].mxu0 }
 0xbed   :  { %v1330_v37 = vadd.f32 %v2897_v33, %v1329_v36  ;;  %v2910_v36 = vld [vmem:[%s4112_s7 + $0x1] ss:$0 sm:$0xff] }
 0xbee   :  { %v1341_v38 = vmul.f32 0.044715, %v1335_v35  ;;  %v1339_v53 = vmul.f32 0.5, %v1335_v35 }
 0xbef   :  { %v1340_v39 = vmul.f32 0.044715, %v1330_v37  ;;  %v1338_v51 = vmul.f32 0.5, %v1330_v37 }
 0xbf0   :  { %v1343_v40 = vmul.f32 %v1341_v38, %v1335_v35 }
 0xbf1   :  { %v1342_v41 = vmul.f32 %v1340_v39, %v1330_v37 }
 0xbf2   :  { %v1345_v42 = vmul.f32 %v1343_v40, %v1335_v35 }
 0xbf3   :  { %v1344_v43 = vmul.f32 %v1342_v41, %v1330_v37 }
 0xbf4   :  { %v1347_v44 = vadd.f32 %v1345_v42, %v1335_v35 }
 0xbf5   :  { %v1346_v45 = vadd.f32 %v1344_v43, %v1330_v37 }
 0xbf6   :  { %v1349_v46 = vmul.f32 0.7978846, %v1347_v44 }
 0xbf7   :  { %v1348_v47 = vmul.f32 0.7978846, %v1346_v45 }
 0xbf8   :  { %3457 = vtanh.f32 %v1349_v46 }
 0xbf9   :  { %3459 = vtanh.f32 %v1348_v47 }
 0xc02   :  { %v3458_v48 = vpop.eup %3457 }
 0xc03   :  { %v3460_v49 = vpop.eup %3459  ;;  %v1353_v50 = vadd.f32 1.0, %v3458_v48 }
 0xc04   :  { %v1352_v52 = vadd.f32 1.0, %v3460_v49 }
 0xc05   :  { %v1355_v55 = vmul.f32 %v1353_v50, %v1339_v53 }
 0xc06   :  { %v1354_v54 = vmul.f32 %v1352_v52, %v1338_v51 }
 0xc08   :  { %3198 = vmatprep.mubr.msk.f32.mxu1 %vm1371_vm8, %v1354_v54 }
 0xc09   :  { %3199 = vmatmul.mubr.msk.f32.vlgmr.msra.gmra.mrb[14].mxu1 %vm1371_vm8, %v1355_v55 }
 0xc0a   :  { %3224 = vmatprep.mubr.msk.f32.mxu1 %vm3523_vm5, %v3522_v22 }
 0xcdc   :  { %v3200_v57 = vpop.f32.mrb[14].mxu1 }
 0xcdd   :  { %v1450_v58 = vadd.f32 %v3200_v57, %v2900_v56  ;;  %v1444_v3 = vpop.f32.mrb[15].mxu1 }
 0xcde   :  { %v1445_v1 = vadd.f32 %v2900_v56, %v1444_v3 }
 0xcdf   :  { %v1454_v59 = vadd.f32 %v1450_v58, %v1245_v19 }
 0xce0   :  { %v1453_v60 = vadd.f32 %v1445_v1, %v1244_v18  ;;  %v3375_v18 = vpack.c.bf16 %v2908_v17, %v2907_v16 }
 0xce1   :  { %v1460_v61 = vsel %vm184_vm4, %v1454_v59, 0.0 }
 0xce2   :  { %1461 = vadd.xlane.f32.xlu1 %v1460_v61  ;;  %v1457_v62 = vsel %vm184_vm4, %v1453_v60, 0.0  ;;  %3376 = vmatprep.subr.bf16.mxu0 %v3375_v18 }
 0xce3   :  { %1458 = vadd.xlane.f32.xlu0 %v1457_v62  ;;  %3378 = vmatpush3.bf16.msra.mxu0 %v3375_v18 }
 0xce4   :  { %3212 = vmatprep.subr.mxu0 %v3522_v22 }
 0xd6f   :  { %v1462_v63 = vpop.xlane.xlu1 %1461 }
 0xd70   :  { %v1464_v0 = vmul.f32 0.03125, %v1462_v63  ;;  %v1459_v2 = vpop.xlane.xlu0 %1458 }
 0xd71   :  { %v1463_v4 = vmul.f32 0.03125, %v1459_v2 }
 0xd72   :  { %v1466_v5 = vsub.f32 %v1454_v59, %v1464_v0 }
 0xd73   :  { %v1465_v6 = vsub.f32 %v1453_v60, %v1463_v4 }
 0xd74   :  { %v1468_v9 = vmul.f32 %v1466_v5, %v1466_v5 }
 0xd75   :  { %v1467_v10 = vmul.f32 %v1465_v6, %v1465_v6 }
 0xd76   :  { %v1472_v11 = vsel %vm184_vm4, %v1468_v9, 0.0 }
 0xd77   :  { %1473 = vadd.xlane.f32.xlu1 %v1472_v11  ;;  %v1469_v12 = vsel %vm184_vm4, %v1467_v10, 0.0 }
 0xd78   :  { %1470 = vadd.xlane.f32.xlu0 %v1469_v12 }
 0xe04   :  { %v1474_v19 = vpop.xlane.xlu1 %1473 }
 0xe05   :  { %v1476_v20 = vmul.f32 0.03125, %v1474_v19  ;;  %v1471_v21 = vpop.xlane.xlu0 %1470 }
 0xe06   :  { %v1475_v24 = vmul.f32 0.03125, %v1471_v21 }
 0xe07   :  { %v1478_v25 = vadd.f32 1e-12, %v1476_v20 }
 0xe08   :  { %v1477_v26 = vadd.f32 1e-12, %v1475_v24 }
 0xe09   :  { %3461 = vrsqrt.f32 %v1478_v25 }
 0xe0a   :  { %3463 = vrsqrt.f32 %v1477_v26 }
 0xe13   :  { %v3462_v27 = vpop.eup %3461 }
 0xe14   :  { %v3464_v30 = vpop.eup %3463  ;;  %v1482_v31 = vmul.f32 %v3462_v27, %v1466_v5 }
 0xe15   :  { %v1481_v23 = vmul.f32 %v3464_v30, %v1465_v6 }
 0xe16   :  { %v1490_v8 = vmul.f32 %v2903_v29, %v1482_v31 }
 0xe17   :  { %v1489_v33 = vmul.f32 %v2903_v29, %v1481_v23 }
 0xe18   :  { %v3906_v35 = vadd.f32 %v2904_v7, %v1490_v8 }
 0xe19   :  { %v3904_v34 = vadd.f32 %v2904_v7, %v1489_v33 }
 0xe1b   :  { %3209 = vmatprep.mubr.msk.f32.mxu0 %vm184_vm4, %v3904_v34 }
 0xe1c   :  { %3210 = vmatmul.mubr.msk.f32.vlgmr.msra.gmra.mrb[10].mxu0 %vm184_vm4, %v3906_v35 }
 0xe1d   :  { %3214 = vmatprep.mubr.msk.f32.mxu0 %vm3523_vm5, %v3522_v22 }
 0xeef   :  { %v3211_v37 = vpop.f32.mrb[10].mxu0 }
 0xef0   :  { %v3917_v38 = vadd.f32 %v3211_v37, %v2910_v36  ;;  %v1584_v39 = vpop.f32.mrb[11].mxu0 }
 0xef1   :  { %v3919_v40 = vadd.f32 %v2910_v36, %v1584_v39 }
 0xef2   :  { %1679 = vrot.lane.b32.xlu1 %v3917_v38, %s3524_s22  ;;  %v1599_v44 = vmul.f32 0.25, %v3917_v38 }
 0xef3   :  { %1601 = vrot.lane.b32.xlu0 %v3919_v40, %s3524_s22  ;;  %v1598_v42 = vmul.f32 0.25, %v3919_v40 }
 0xf64   :  { %v1680_v43 = vpop.permute.xlu1 %1679 }
 0xf65   :  { %v1602_v41 = vpop.permute.xlu0 %1601 }
 0xf66   :  { %3213 = vmatpush3.xpose.msk.msra.mxu0 %vm370_vm6, %v1602_v41 }
 0xf67   :  { %3217 = vmatprep.subr.mxu0 %v3522_v22 }
 0xf69   :  { %3215 = vmatmul.mubr.msk.f32.vlgmr.msra.gmra.mrb[12].mxu0 %vm370_vm6, %v1598_v42 }
 0xf6a   :  { %3218 = vmatpush3.xpose.msk.msra.mxu0 %vm370_vm6, %v1680_v43  ;;  %3219 = vmatprep.mubr.msk.f32.mxu0 %vm3523_vm5, %v3522_v22 }
 0xf6b   :  { %3227 = vmatprep.subr.mxu0 %v3522_v22 }
 0xf6d   :  { %3220 = vmatmul.mubr.msk.f32.vlgmr.msra.gmra.mrb[14].mxu0 %vm370_vm6, %v1599_v44 }
 0xf6e   :  { %3229 = vmatprep.mubr.msk.f32.mxu0 %vm3523_vm5, %v3522_v22 }
0x103c   :  { %v1674_v45 = vpop.f32.mrb[12].mxu0 }
0x103d   :  { %v1675_v46 = vadd.f32 %v1674_v45, %v3751_v28  ;;  %v3216_v47 = vpop.f32.mrb[13].mxu0 }
0x103e   :  { %v2913_v47 = vld [vmem:[%s4113_s8 + $0x20] sm:$0xff] }
0x103f   :  { %v1756_v48 = vsel %vm524_vm7, %v1675_v46, -inf }
0x1040   :  { %1757 = vmax.xlane.f32.xlu1 %v1756_v48  ;;  %v1752_v49 = vpop.f32.mrb[14].mxu0  ;;  %v2914_v48 = vld [vmem:[%s4113_s8 + $0x28] sm:$0xff] }
0x1041   :  { %v1753_v50 = vadd.f32 %v1752_v49, %v3754_v32  ;;  %v3221_v51 = vpop.f32.mrb[15].mxu0  ;;  %v3383_v49 = vpack.c.bf16 %v2914_v48, %v2913_v47 }
0x1043   :  { %v1759_v52 = vsel %vm524_vm7, %v1753_v50, -inf }
0x1044   :  { %1760 = vmax.xlane.f32.xlu0 %v1759_v52 }
0x1051   :  { %1854 = vrot.lane.b32.xlu1 %v3917_v38, %s3526_s23 }
0x1055   :  { %1932 = vrot.lane.b32.xlu1 %v3919_v40, %s3527_s3 }
0x105a   :  { %1778 = vrot.lane.b32.xlu0 %v3919_v40, %s3526_s23 }
0x10cd   :  { %v1758_v53 = vpop.xlane.xlu1 %1757 }
0x10ce   :  { %v1762_v54 = vsub.f32 %v1675_v46, %v1758_v53 }
0x10d0   :  { %v1764_v55 = vmul.f32 1.442695, %v1762_v54  ;;  %v2934_v54 = vld [vmem:[%s4114_s9 + $0x1] ss:$0 sm:$0xff] }
0x10d1   :  { %v1855_v56 = vpop.permute.xlu1 %1854  ;;  %v1761_v57 = vpop.xlane.xlu0 %1760 }
0x10d2   :  { %3465 = vpow2.f32 %v1764_v55  ;;  %v1763_v58 = vsub.f32 %v1753_v50, %v1761_v57  ;;  %3228 = vmatpush3.msra.mxu0 %v1855_v56 }
0x10d3   :  { %3237 = vmatprep.subr.mxu0 %v3522_v22 }
0x10d4   :  { %v1766_v3 = vmul.f32 1.442695, %v1763_v58 }
0x10d5   :  { %v1779_v1 = vpop.permute.xlu0 %1778  ;;  %v1933_v63 = vpop.permute.xlu1 %1932 }
0x10d6   :  { %3467 = vpow2.f32 %v1766_v3  ;;  %3223 = vmatpush3.msra.mxu1 %v1779_v1 }
0x10d7   :  { %3232 = vmatprep.subr.mxu1 %v3522_v22 }
0x10dc   :  { %v3466_v59 = vpop.eup %3465 }
0x10dd   :  { %v1768_v60 = vsel %vm524_vm7, %v3466_v59, 0.0 }
0x10de   :  { %1769 = vadd.xlane.f32.xlu0 %v1768_v60 }
0x10e0   :  { %v3468_v61 = vpop.eup %3467 }
0x10e1   :  { %v1771_v62 = vsel %vm524_vm7, %v3468_v61, 0.0 }
0x10e2   :  { %1772 = vadd.xlane.f32.xlu1 %v1771_v62 }
0x10f3   :  { %1930 = vrot.lane.b32.xlu1 %v1598_v42, %s3528_s26 }
0x10f4   :  { %2010 = vrot.lane.b32.xlu0 %v3917_v38, %s3527_s3 }
0x10f8   :  { %2008 = vrot.lane.b32.xlu0 %v1599_v44, %s3528_s26 }
0x116b   :  { %v1770_v0 = vpop.xlane.xlu0 %1769 }
0x116c   :  { %3469 = vrcp.f32 %v1770_v0 }
0x116f   :  { %v1773_v2 = vpop.xlane.xlu1 %1772  ;;  %v2011_v9 = vpop.permute.xlu0 %2010 }
0x1170   :  { %3471 = vrcp.f32 %v1773_v2 }
0x1173   :  { %v1931_v11 = vpop.permute.xlu1 %1930  ;;  %v2009_v12 = vpop.permute.xlu0 %2008 }
0x1176   :  { %v3470_v4 = vpop.eup %3469 }
0x1177   :  { %v1776_v5 = vmul.f32 %v3470_v4, %v3466_v59 }
0x1179   :  { %3225 = vmatmul.mubr.msk.f32.vlgmr.msra.gmra.mrb[16].mxu1 %vm524_vm7, %v1776_v5 }
0x117a   :  { %v3472_v6 = vpop.eup %3471  ;;  %3233 = vmatpush3.xpose.msk.msra.mxu1 %vm370_vm6, %v1933_v63  ;;  %3234 = vmatprep.mubr.msk.f32.mxu1 %vm3523_vm5, %v3522_v22 }
0x117b   :  { %v1777_v10 = vmul.f32 %v3472_v6, %v3468_v61  ;;  %3242 = vmatprep.subr.mxu1 %v3522_v22 }
0x117d   :  { %3230 = vmatmul.mubr.msk.f32.vlgmr.msra.gmra.mrb[16].mxu0 %vm524_vm7, %v1777_v10  ;;  %3235 = vmatmul.mubr.msk.f32.vlgmr.msra.gmra.mrb[18].mxu1 %vm370_vm6, %v1931_v11  ;;  %v2940_v10 = vld [vmem:[%s4117_s12 + $0x28] sm:$0xff] }
0x117e   :  { %3238 = vmatpush3.xpose.msk.msra.mxu0 %vm370_vm6, %v2011_v9  ;;  %3239 = vmatprep.mubr.msk.f32.mxu0 %vm3523_vm5, %v3522_v22 }
0x117f   :  { %3247 = vmatprep.subr.mxu0 %v3522_v22  ;;  %3244 = vmatprep.mubr.msk.f32.mxu1 %vm3523_vm5, %v3522_v22 }
0x1181   :  { %3240 = vmatmul.mubr.msk.f32.vlgmr.msra.gmra.mrb[18].mxu0 %vm370_vm6, %v2009_v12  ;;  %v2941_v12 = vld [vmem:[%s4117_s12 + $0x30] sm:$0xff] }
0x1182   :  { %3249 = vmatprep.mubr.msk.f32.mxu0 %vm3523_vm5, %v3522_v22 }
0x124c   :  { %v1850_v13 = vpop.f32.mrb[16].mxu1 }
0x124d   :  { %v3226_v14 = vpop.f32.mrb[17].mxu1 }
0x1250   :  { %v1926_v15 = vpop.f32.mrb[16].mxu0  ;;  %v2004_v16 = vpop.f32.mrb[18].mxu1 }
0x1251   :  { %v2005_v17 = vadd.f32 %v2004_v16, %v3751_v28  ;;  %v3231_v18 = vpop.f32.mrb[17].mxu0  ;;  %v3236_v19 = vpop.f32.mrb[19].mxu1 }
0x1253   :  { %v2086_v20 = vsel %vm524_vm7, %v2005_v17, -inf }
0x1254   :  { %2087 = vmax.xlane.f32.xlu1 %v2086_v20  ;;  %v2082_v21 = vpop.f32.mrb[18].mxu0 }
0x1255   :  { %v2083_v24 = vadd.f32 %v2082_v21, %v3754_v32  ;;  %v3241_v25 = vpop.f32.mrb[19].mxu0 }
0x1257   :  { %v2089_v26 = vsel %vm524_vm7, %v2083_v24, -inf }
0x1258   :  { %2090 = vmax.xlane.f32.xlu0 %v2089_v26 }
0x12e1   :  { %v2088_v27 = vpop.xlane.xlu1 %2087 }
0x12e2   :  { %v2092_v29 = vsub.f32 %v2005_v17, %v2088_v27 }
0x12e4   :  { %v2094_v30 = vmul.f32 1.442695, %v2092_v29  ;;  %v2938_v29 = vld [vmem:[%s4116_s11 + $0x1] ss:$0 sm:$0xff] }
0x12e5   :  { %v2091_v31 = vpop.xlane.xlu0 %2090 }
0x12e6   :  { %3473 = vpow2.f32 %v2094_v30  ;;  %v2093_v23 = vsub.f32 %v2083_v24, %v2091_v31  ;;  %v2937_v24 = vld [vmem:[%s4115_s10 + $0x1] ss:$0 sm:$0xff] }
0x12e8   :  { %v2096_v7 = vmul.f32 1.442695, %v2093_v23 }
0x12ea   :  { %3475 = vpow2.f32 %v2096_v7 }
0x12f0   :  { %v3474_v28 = vpop.eup %3473 }
0x12f1   :  { %v2098_v8 = vsel %vm524_vm7, %v3474_v28, 0.0 }
0x12f2   :  { %2099 = vadd.xlane.f32.xlu0 %v2098_v8  ;;  %v2948_v8 = vld [vmem:[%s4119_s14 + $0x48] sm:$0xff] }
0x12f4   :  { %v3476_v33 = vpop.eup %3475 }
0x12f5   :  { %v2101_v36 = vsel %vm524_vm7, %v3476_v33, 0.0 }
0x12f6   :  { %2102 = vadd.xlane.f32.xlu1 %v2101_v36  ;;  %v2949_v36 = vld [vmem:[%s4119_s14 + $0x50] sm:$0xff] }
0x1307   :  { %2184 = vrot.lane.b32.xlu1 %v3917_v38, %s3529_s27  ;;  %v2915_v38 = vld [vmem:[%s4113_s8 + $0x30] sm:$0xff] }
0x1308   :  { %2108 = vrot.lane.b32.xlu0 %v3919_v40, %s3529_s27  ;;  %v2916_v40 = vld [vmem:[%s4113_s8 + $0x38] sm:$0xff] }
0x1309   :  { %v3379_v46 = vpack.c.bf16 %v2916_v40, %v2915_v38 }
0x137f   :  { %v2100_v32 = vpop.xlane.xlu0 %2099 }
0x1380   :  { %3477 = vrcp.f32 %v2100_v32  ;;  %v2950_v32 = vld [vmem:[%s4119_s14 + $0x58] sm:$0xff] }
0x1383   :  { %v2103_v37 = vpop.xlane.xlu1 %2102  ;;  %v2109_v39 = vpop.permute.xlu0 %2108 }
0x1384   :  { %3479 = vrcp.f32 %v2103_v37  ;;  %3243 = vmatpush3.msra.mxu1 %v2109_v39  ;;  %v3399_v37 = vpack.c.bf16 %v2950_v32, %v2949_v36  ;;  %v2952_v39 = vld [vmem:[%s4119_s14 + $0x68] sm:$0xff]  ;;  %v2961_v32 = vld [vmem:[%s4121_s16 + $0x1] ss:$0 sm:$0xff] }
0x1385   :  { %3380 = vmatprep.subr.bf16.mxu1 %v3379_v46 }
0x1387   :  { %v2185_v41 = vpop.permute.xlu1 %2184 }
0x1388   :  { %3248 = vmatpush3.msra.mxu0 %v2185_v41 }
0x138a   :  { %v3478_v42 = vpop.eup %3477 }
0x138b   :  { %v2106_v43 = vmul.f32 %v3478_v42, %v3474_v28  ;;  %v2947_v28 = vld [vmem:[%s4119_s14 + $0x40] sm:$0xff]  ;;  %v2953_v42 = vld [vmem:[%s4119_s14 + $0x70] sm:$0xff] }
0x138d   :  { %3245 = vmatmul.mubr.msk.f32.vlgmr.msra.gmra.mrb[20].mxu1 %vm524_vm7, %v2106_v43  ;;  %v2954_v43 = vld [vmem:[%s4119_s14 + $0x78] sm:$0xff] }
0x138e   :  { %v3480_v44 = vpop.eup %3479  ;;  %3382 = vmatpush3.bf16.msra.mxu1 %v3379_v46 }
0x138f   :  { %v2107_v45 = vmul.f32 %v3480_v44, %v3476_v33  ;;  %3384 = vmatprep.subr.bf16.mxu1 %v3383_v49  ;;  %v3395_v33 = vpack.c.bf16 %v2948_v8, %v2947_v28  ;;  %v3407_v44 = vpack.c.bf16 %v2954_v43, %v2953_v42 }
0x1391   :  { %3250 = vmatmul.mubr.msk.f32.vlgmr.msra.gmra.mrb[20].mxu0 %vm524_vm7, %v2107_v45  ;;  %v2944_v45 = vld [vmem:[%s4118_s13 + $0x1] ss:$0 sm:$0xff] }
0x1460   :  { %v2180_v50 = vpop.f32.mrb[20].mxu1 }
0x1461   :  { %v3246_v51 = vpop.f32.mrb[21].mxu1  ;;  %3256 = vmatprep.mubr.msk.f32.mxu1 %vm370_vm6, %v2180_v50 }
0x1464   :  { %v2256_v52 = vpop.f32.mrb[20].mxu0 }
0x1465   :  { %v3251_v53 = vpop.f32.mrb[21].mxu0  ;;  %3257 = vmatmul.mubr.msk.f32.vlgmr.msra.gmra.mrb[22].mxu1 %vm370_vm6, %v2256_v52 }
0x1466   :  { %3386 = vmatpush3.bf16.msra.mxu1 %v3383_v49  ;;  %3263 = vmatprep.mubr.msk.f32.mxu1 %vm370_vm6, %v1850_v13  ;;  %v2942_v13 = vld [vmem:[%s4117_s12 + $0x38] sm:$0xff] }
0x1467   :  { %v3391_v14 = vpack.c.bf16 %v2942_v13, %v2941_v12  ;;  %3396 = vmatprep.subr.bf16.mxu1 %v3395_v33 }
0x146d   :  { %3264 = vmatmul.mubr.msk.f32.vlgmr.msra.gmra.mrb[22].mxu1 %vm370_vm6, %v1926_v15 }
0x146e   :  { %3398 = vmatpush3.bf16.msra.mxu1 %v3395_v33 }
0x146f   :  { %3400 = vmatprep.subr.bf16.mxu1 %v3399_v37 }
0x1472   :  { %3402 = vmatpush3.bf16.msra.mxu1 %v3399_v37 }
0x1540   :  { %v3265_v55 = vpop.f32.mrb[22].mxu1 }
0x1541   :  { %v2431_v56 = vadd.f32 %v3265_v55, %v2934_v54  ;;  %v2413_v57 = vpop.f32.mrb[23].mxu1 }
0x1542   :  { %v2430_v58 = vadd.f32 %v2934_v54, %v2413_v57 }
0x1543   :  { %v2433_v3 = vadd.f32 %v2431_v56, %v3906_v35 }
0x1544   :  { %v2432_v1 = vadd.f32 %v2430_v58, %v3904_v34  ;;  %v2939_v34 = vld [vmem:[%s4117_s12 + $0x20] sm:$0xff] }
0x1545   :  { %v2441_v59 = vsel %vm184_vm4, %v2433_v3, 0.0  ;;  %v3387_v11 = vpack.c.bf16 %v2940_v10, %v2939_v34 }
0x1546   :  { %2442 = vadd.xlane.f32.xlu0 %v2441_v59  ;;  %v2438_v60 = vsel %vm184_vm4, %v2432_v1, 0.0 }
0x1547   :  { %2439 = vadd.xlane.f32.xlu1 %v2438_v60  ;;  %3388 = vmatprep.subr.bf16.mxu0 %v3387_v11 }
0x1548   :  { %3390 = vmatpush3.bf16.msra.mxu0 %v3387_v11 }
0x1549   :  { %3392 = vmatprep.subr.bf16.mxu0 %v3391_v14 }
0x154c   :  { %3394 = vmatpush3.bf16.msra.mxu0 %v3391_v14 }
0x15d3   :  { %v2443_v61 = vpop.xlane.xlu0 %2442 }
0x15d4   :  { %v2445_v62 = vmul.f32 0.03125, %v2443_v61  ;;  %v2440_v63 = vpop.xlane.xlu1 %2439 }
0x15d5   :  { %v2444_v0 = vmul.f32 0.03125, %v2440_v63 }
0x15d6   :  { %v2447_v2 = vsub.f32 %v2433_v3, %v2445_v62 }
0x15d7   :  { %v2446_v4 = vsub.f32 %v2432_v1, %v2444_v0  ;;  %v2956_v0 = vld [vmem:[%s4140_s1 + $0x1] ss:$0 sm:$0xff] }
0x15d8   :  { %v2449_v5 = vmul.f32 %v2447_v2, %v2447_v2 }
0x15d9   :  { %v2448_v6 = vmul.f32 %v2446_v4, %v2446_v4 }
0x15da   :  { %v2453_v9 = vsel %vm184_vm4, %v2449_v5, 0.0 }
0x15db   :  { %2454 = vadd.xlane.f32.xlu1 %v2453_v9  ;;  %v2450_v35 = vsel %vm184_vm4, %v2448_v6, 0.0 }
0x15dc   :  { %2451 = vadd.xlane.f32.xlu0 %v2450_v35 }
0x1668   :  { %v2455_v15 = vpop.xlane.xlu1 %2454 }
0x1669   :  { %v2457_v16 = vmul.f32 0.03125, %v2455_v15  ;;  %v2452_v17 = vpop.xlane.xlu0 %2451 }
0x166a   :  { %v2456_v18 = vmul.f32 0.03125, %v2452_v17 }
0x166b   :  { %v2459_v19 = vadd.f32 1e-12, %v2457_v16 }
0x166c   :  { %v2458_v20 = vadd.f32 1e-12, %v2456_v18 }
0x166d   :  { %3481 = vrsqrt.f32 %v2459_v19 }
0x166e   :  { %3483 = vrsqrt.f32 %v2458_v20 }
0x1677   :  { %v3482_v21 = vpop.eup %3481 }
0x1678   :  { %v3484_v25 = vpop.eup %3483  ;;  %v2463_v26 = vmul.f32 %v3482_v21, %v2447_v2  ;;  %v2752_v21 = vld [vmem:[%s4123_s18] sm:$0xff] }
0x1679   :  { %v2462_v27 = vmul.f32 %v3484_v25, %v2446_v4  ;;  %v2754_v25 = vld [vmem:[%s4123_s18 + $0x10] sm:$0xff] }
0x167a   :  { %v2471_v30 = vmul.f32 %v2937_v24, %v2463_v26  ;;  %v3530_v26 = vmov 0.0|0.0  }
0x167b   :  { %v2470_v31 = vmul.f32 %v2937_v24, %v2462_v27  ;;  %v2753_v24 = vld [vmem:[%s4123_s18 + $0x8] sm:$0xff]  ;;  %3411 = vmatprep.subr.bf16.mxu0 %v3530_v26 }
0x167c   :  { %v2479_v7 = vadd.f32 %v2938_v29, %v2471_v30  ;;  %v3412_v27 = vpack.c.bf16 %v2753_v24, %v2752_v21 }
0x167d   :  { %v2478_v23 = vadd.f32 %v2938_v29, %v2470_v31  ;;  %v2755_v29 = vld [vmem:[%s4123_s18 + $0x18] sm:$0xff] }
0x167e   :  { %v3415_v30 = vpack.c.bf16 %v2755_v29, %v2754_v25 }
0x167f   :  { %3274 = vmatprep.mubr.msk.f32.mxu0 %vm184_vm4, %v2478_v23 }
0x1680   :  { %3275 = vmatmul.mubr.msk.f32.vlgmr.msra.gmra.mrb[22].mxu0 %vm184_vm4, %v2479_v7 }
0x1681   :  { %3304 = vmatprep.mubr.msk.f32.mxu0 %vm3523_vm5, %v3522_v22  ;;  %v2951_v22 = vld [vmem:[%s4119_s14 + $0x60] sm:$0xff]  ;;  %3413 = vmatpush3.bf16.msra.mxu0 %v3412_v27 }
0x1682   :  { %v3403_v41 = vpack.c.bf16 %v2952_v39, %v2951_v22  ;;  %3414 = vmatprep.subr.bf16.mxu0 %v3530_v26  ;;  %v2962_v39 = vld [vmem:[%s4122_s17 + $0x1] ss:$0 sm:$0xff] }
0x1684   :  { %3404 = vmatprep.subr.bf16.mxu1 %v3403_v41 }
0x1685   :  { %3406 = vmatpush3.bf16.msra.mxu1 %v3403_v41  ;;  %3416 = vmatpush3.bf16.msra.mxu0 %v3415_v30 }
0x1686   :  { %3408 = vmatprep.subr.bf16.mxu1 %v3407_v44 }
0x1689   :  { %3410 = vmatpush3.bf16.msra.mxu1 %v3407_v44 }
0x1753   :  { %v3276_v38 = vpop.f32.mrb[22].mxu0 }
0x1754   :  { %v2571_v40 = vadd.f32 %v3276_v38, %v2944_v45  ;;  %v2565_v46 = vpop.f32.mrb[23].mxu0 }
0x1755   :  { %v2566_v47 = vadd.f32 %v2944_v45, %v2565_v46 }
0x1756   :  { %v2577_v48 = vmul.f32 0.044715, %v2571_v40  ;;  %v2575_v61 = vmul.f32 0.5, %v2571_v40 }
0x1757   :  { %v2576_v49 = vmul.f32 0.044715, %v2566_v47  ;;  %v2574_v59 = vmul.f32 0.5, %v2566_v47 }
0x1758   :  { %v2579_v50 = vmul.f32 %v2577_v48, %v2571_v40 }
0x1759   :  { %v2578_v51 = vmul.f32 %v2576_v49, %v2566_v47 }
0x175a   :  { %v2581_v52 = vmul.f32 %v2579_v50, %v2571_v40 }
0x175b   :  { %v2580_v53 = vmul.f32 %v2578_v51, %v2566_v47 }
0x175c   :  { %v2583_v54 = vadd.f32 %v2581_v52, %v2571_v40 }
0x175d   :  { %v2582_v55 = vadd.f32 %v2580_v53, %v2566_v47 }
0x175e   :  { %v2585_v56 = vmul.f32 0.7978846, %v2583_v54 }
0x175f   :  { %v2584_v57 = vmul.f32 0.7978846, %v2582_v55 }
0x1760   :  { %3485 = vtanh.f32 %v2585_v56 }
0x1761   :  { %3487 = vtanh.f32 %v2584_v57 }
0x176a   :  { %v3486_v58 = vpop.eup %3485 }
0x176b   :  { %v3488_v3 = vpop.eup %3487  ;;  %v2589_v1 = vadd.f32 1.0, %v3486_v58 }
0x176c   :  { %v2588_v60 = vadd.f32 1.0, %v3488_v3  ;;  %v2963_v3 = vld [vmem:[%s4124_s19] ss:$0 sm:$0xff]  ;;  %s3531_s19 = smov [#allocation2]  }
0x176d   :  { %v2591_v63 = vmul.f32 %v2589_v1, %v2575_v61  ;;  %s2860_s26 = sshll.u32 %s3531_s19, 4  ;;  %s2861_s26 = int_to_ptr.vmem [resolvable:$true] %s2860_s26 }
0x176e   :  { %v2590_v62 = vmul.f32 %v2588_v60, %v2574_v59  ;;  %s3497_s27 = scalar_lea.vmem %s2861_s26, 32  ;;  %p3502_p1 = scmp.lt.s32.totalorder %s2861_s26, %s2861_s26 }
0x176f   :  { %p3498_p0 = scmp.ne.s32.totalorder %s2861_s26, %s3497_s27  ;;  %p3503_p2 = scmp.lt.s32.totalorder %s3497_s27, %s3497_s27 }
0x1770   :  { %3293 = vmatprep.mubr.msk.f32.mxu1 %vm1371_vm8, %v2590_v62 }
0x1771   :  { %3294 = vmatmul.mubr.msk.f32.vlgmr.msra.gmra.mrb[24].mxu1 %vm1371_vm8, %v2591_v63  ;;  %p3504_p3 = por %p3503_p2, %p3502_p1 }
0x1773   :  { %p3505_p4 = pnand %p3504_p3, %p3498_p0 }
0x1844   :  { %v3295_v2 = vpop.f32.mrb[24].mxu1 }
0x1845   :  { %v2687_v4 = vadd.f32 %v3295_v2, %v2956_v0  ;;  %v2681_v5 = vpop.f32.mrb[25].mxu1 }
0x1846   :  { %v2682_v6 = vadd.f32 %v2956_v0, %v2681_v5 }
0x1847   :  { %v2691_v9 = vadd.f32 %v2687_v4, %v2479_v7 }
0x1848   :  { %v2690_v35 = vadd.f32 %v2682_v6, %v2478_v23 }
0x1849   :  { %v2699_v34 = vsel %vm184_vm4, %v2691_v9, 0.0 }
0x184a   :  { %2700 = vadd.xlane.f32.xlu1 %v2699_v34  ;;  %v2696_v10 = vsel %vm184_vm4, %v2690_v35, 0.0 }
0x184b   :  { %2697 = vadd.xlane.f32.xlu0 %v2696_v10 }
0x18d7   :  { %v2701_v11 = vpop.xlane.xlu1 %2700 }
0x18d8   :  { %v2703_v12 = vmul.f32 0.03125, %v2701_v11  ;;  %v2698_v13 = vpop.xlane.xlu0 %2697 }
0x18d9   :  { %v2702_v14 = vmul.f32 0.03125, %v2698_v13 }
0x18da   :  { %v2705_v15 = vsub.f32 %v2691_v9, %v2703_v12 }
0x18db   :  { %v2704_v16 = vsub.f32 %v2690_v35, %v2702_v14 }
0x18dc   :  { %v2707_v17 = vmul.f32 %v2705_v15, %v2705_v15 }
0x18dd   :  { %v2706_v18 = vmul.f32 %v2704_v16, %v2704_v16 }
0x18de   :  { %v2711_v19 = vsel %vm184_vm4, %v2707_v17, 0.0 }
0x18df   :  { %2712 = vadd.xlane.f32.xlu1 %v2711_v19  ;;  %v2708_v20 = vsel %vm184_vm4, %v2706_v18, 0.0 }
0x18e0   :  { %2709 = vadd.xlane.f32.xlu0 %v2708_v20 }
0x196c   :  { %v2713_v31 = vpop.xlane.xlu1 %2712 }
0x196d   :  { %v2715_v23 = vmul.f32 0.03125, %v2713_v31  ;;  %v2710_v7 = vpop.xlane.xlu0 %2709 }
0x196e   :  { %v2714_v28 = vmul.f32 0.03125, %v2710_v7 }
0x196f   :  { %v2717_v8 = vadd.f32 1e-12, %v2715_v23 }
0x1970   :  { %v2716_v33 = vadd.f32 1e-12, %v2714_v28 }
0x1971   :  { %3489 = vrsqrt.f32 %v2717_v8 }
0x1972   :  { %3491 = vrsqrt.f32 %v2716_v33 }
0x197b   :  { %v3490_v36 = vpop.eup %3489 }
0x197c   :  { %v3492_v37 = vpop.eup %3491  ;;  %v2721_v22 = vmul.f32 %v3490_v36, %v2705_v15 }
0x197d   :  { %v2720_v41 = vmul.f32 %v3492_v37, %v2704_v16 }
0x197e   :  { %v2729_v42 = vmul.f32 %v2961_v32, %v2721_v22 }
0x197f   :  { %v2728_v43 = vmul.f32 %v2961_v32, %v2720_v41 }
0x1980   :  { %v2737_v44 = vadd.f32 %v2962_v39, %v2729_v42 }
0x1981   :  { %v2736_v45 = vadd.f32 %v2962_v39, %v2728_v43 }
0x1982   :  { %v2745_v38 = vsel %vm184_vm4, %v2737_v44, -inf }
0x1983   :  { %v2738_v40 = vsel %vm184_vm4, %v2736_v45, -inf  ;;  %v2746_v46 = vrot.slane %v2745_v38, 4 }
0x1984   :  { %v2739_v47 = vrot.slane %v2738_v40, 4 }
0x1985   :  { %v2747_v48 = vmax.f32 %v2745_v38, %v2746_v46 }
0x1986   :  { %v2740_v49 = vmax.f32 %v2738_v40, %v2739_v47 }
0x1987   :  { %v2748_v50 = vrot.slane %v2747_v48, 2 }
0x1988   :  { %v2741_v51 = vrot.slane %v2740_v49, 2 }
0x1989   :  { %v2749_v52 = vmax.f32 %v2747_v48, %v2748_v50 }
0x198a   :  { %v2742_v53 = vmax.f32 %v2740_v49, %v2741_v51 }
0x198b   :  { %v2750_v54 = vrot.slane %v2749_v52, 1 }
0x198c   :  { %v2743_v55 = vrot.slane %v2742_v53, 1 }
0x198d   :  { %v2751_v56 = vmax.f32 %v2749_v52, %v2750_v54 }
0x198e   :  { %v2744_v57 = vmax.f32 %v2742_v53, %v2743_v55 }
0x1990   :  { %v2766_v58 = vsel %vm2765_vm9, %v2751_v56, %v2744_v57 }
0x1991   :  { %3305 = vmatmul.mubr.msk.f32.vlgmr.msra.gmra.mrb[24].mxu0 %vm184_vm4, %v2766_v58 }
0x1a64   :  { %v2835_v1 = vpop.f32.mrb[24].mxu0 }
0x1a65   :  { %v2836_v59 = vadd.f32 %v2963_v3, %v2835_v1  ;;  %v3306_v60 = vpop.f32.mrb[25].mxu0 }
0x1a67   :  { %v2840_v61 = vsel %vm2839_vm10, %v2836_v59, -inf }
0x1a68   :  { %2841 = vmax.xlane.f32.xlu0 %v2840_v61 }
0x1af5   :  { %v2842_v62 = vpop.xlane.xlu0 %2841 }
0x1af6   :  { %v2843_v63 = vsub.f32 %v2836_v59, %v2842_v62 }
0x1af8   :  { %v2844_v0 = vmul.f32 1.442695, %v2843_v63 }
0x1afa   :  { %3493 = vpow2.f32 %v2844_v0 }
0x1b04   :  { %v3494_v2 = vpop.eup %3493 }
0x1b05   :  { %v2846_v4 = vsel %vm2839_vm10, %v3494_v2, 0.0 }
0x1b06   :  { %2847 = vadd.xlane.f32.xlu1 %v2846_v4 }
0x1b93   :  { %v2848_v5 = vpop.xlane.xlu1 %2847 }
0x1b94   :  { %3495 = vlog2.f32 %v2848_v5 }
0x1b9e   :  { %v3496_v6 = vpop.eup %3495 }
0x1b9f   :  { %v2850_v9 = vmul.f32 0.6931472, %v3496_v6 }
0x1ba1   :  { %v2851_v35 = vadd.f32 %v2850_v9, %v2842_v62 }
0x1ba3   :  { %v2852_v34 = vsub.f32 %v2836_v59, %v2851_v35 }
0x1ba5   :  { %2853 = vst.msk [vmem:[#allocation2] sm:$0x3] %vm2839_vm10, %v2852_v34 }
0x1ba6   :  { %3508 = shalt.err (!%p3505_p4)
}
0x1ba7   :  { %s3509_s25 = scalar_lea.hbm %s4125_s20, 32 }
0x1ba8   :  { %p3510_p5 = scmp.ne.s32.totalorder %s4125_s20, %s3509_s25  ;;  %p3513_p6 = scmp.lt.u32.totalorder %s3509_s25, %s4125_s20 }
0x1baa   :  { %p3515_p7 = pnand %p3513_p6, %p3510_p5 }
0x1bac   :  { %3518 = shalt.err (!%p3515_p7)
}
0x1bad   :  { %2863 = dma.vmem_to_hbm [thread:$0]  %s2861_s26, 32, %s4125_s20, [#allocation3]  }
0x1bae   :  { %3519 = dma.done.wait [#allocation3], 32  }
0x1baf   :  { %3520 = vsyncadd [#allocation3], 4294967264 }
0x1bb0   :  { %2867 = vsyncpa [#allocation3], 1 }

</bundles_post_ra>
